<compile_context>
chip_gen: v7x
topology: tpu7x:2x2x1
jax: 0.10.0
libtpu: 0.0.40
codegen_flags: <defaults>
</compile_context>

<pallas_src>
import jax
import jax.numpy as jnp
import numpy as np
from jax.experimental import pallas as pl
from jax.experimental.pallas import tpu as pltpu

_NEG = -1e30        # masks padded vocab columns out of the softmax (f32 exp -> exact 0)
_VOCAB_PAD = 1000   # extended pointer vocab width (matches nn.ZeroPad2d in the module)


def _round_up(x, m):
    return ((x + m - 1) // m) * m


# ----------------------------------------------------------------------------
# Fused kernel: GRU step + coverage attention + output head + pointer mixture
# ----------------------------------------------------------------------------
def _fused_kernel(scalars_ref, xh_ref, enc_ref, prev_sum_ref, idx_ref,
                  w_gru_ref, b_gru_ref,
                  w_h_ref, w_s_ref, w_c_ref, v_att_ref,
                  w_oh_h_ref, w_oh_c_ref, b_oh_ref,
                  w_ov_ref, b_ov_ref,
                  wg_h_ref, wg_c_ref, wg_e_ref,
                  pfinal_ref, pvocab_ref, att_ref, pgen_ref, hout_ref):
    f32 = jnp.float32
    bf16 = jnp.bfloat16

    xh = xh_ref[...]                                     # (B, E+H) f32, [emb | h_prev]
    B = xh.shape[0]
    H = hout_ref.shape[1]
    E = xh.shape[1] - H
    L = att_ref.shape[1]
    Vp = pfinal_ref.shape[1]                             # 128-aligned extended vocab
    Vvp = pvocab_ref.shape[1]                            # 128-aligned vocab prefix

    emb = xh[:, :E]                                      # (B, E)
    h = xh[:, E:]                                        # (B, H)

    # ---- stage 1: GRU step, ONE fused MXU matmul (bf16 operands, f32 accumulate) ----
    # fused weight columns: [r | z | n_input | n_hidden]  (width 4H, lane-aligned)
    g = jnp.dot(xh.astype(bf16), w_gru_ref[...],
                preferred_element_type=f32) + b_gru_ref[...]          # (B, 4H) f32
    r = jax.nn.sigmoid(g[:, 0:H])
    z = jax.nn.sigmoid(g[:, H:2 * H])
    n = jnp.tanh(g[:, 2 * H:3 * H] + r * g[:, 3 * H:4 * H])
    h_new = (1.0 - z) * n + z * h                                     # (B, H)
    hout_ref[...] = h_new

    # ---- stage 2: coverage attention (f32 elementwise; exact softmax norm) ----
    enc = enc_ref[...]                                   # (B, L, H)
    att_bias = scalars_ref[0]                            # SMEM scalar
    cov = w_c_ref[...] * prev_sum_ref[...]               # (B, L)
    e = jnp.tanh(w_h_ref[...] * enc
                 + (w_s_ref[...] * h_new)[:, None, :]
                 + cov[:, :, None]
                 + att_bias)                             # (B, L, H)
    score = jnp.sum(v_att_ref[...] * e, axis=-1)         # (B, L)
    m = jnp.max(score, axis=-1, keepdims=True)
    p = jnp.exp(score - m)
    att = p * pl.reciprocal(jnp.sum(p, axis=-1, keepdims=True), approx=False)
    att_ref[...] = att
    # TODO(synk): at production L/H move this onto the MXU via a batched einsum.
    ctx = jnp.sum(att[:, :, None] * enc, axis=1)         # (B, H)

    # ---- stage 3: output head (concat folded into split bf16 weights; vocab padded) ----
    hid = (jnp.dot(h_new.astype(bf16), w_oh_h_ref[...], preferred_element_type=f32)
           + jnp.dot(ctx.astype(bf16), w_oh_c_ref[...], preferred_element_type=f32)
           + b_oh_ref[...])                              # (B, E) f32
    logits = (jnp.dot(hid.astype(bf16), w_ov_ref[...], preferred_element_type=f32)
              + b_ov_ref[...])                           # (B, Vp) f32, pad cols = -1e30
    lm = jnp.max(logits, axis=-1, keepdims=True)
    ex = jnp.exp(logits - lm)
    p_vocab_ext = ex * pl.reciprocal(jnp.sum(ex, axis=-1, keepdims=True), approx=False)
    # 128-aligned prefix -> dense (unmasked) store; cols >= V are exactly 0.
    pvocab_ref[...] = p_vocab_ext[:, :Vvp]

    gen_bias = scalars_ref[1]
    gsum = (jnp.sum(h_new * wg_h_ref[...], axis=-1, keepdims=True)
            + jnp.sum(ctx * wg_c_ref[...], axis=-1, keepdims=True)
            + jnp.sum(emb * wg_e_ref[...], axis=-1, keepdims=True)
            + gen_bias)
    p_gen = jax.nn.sigmoid(gsum)                         # (B, 1)
    pgen_ref[...] = p_gen

    # ---- stage 4: scatter_add over the extended vocab ----
    # Ref column reads (vld) instead of masked cross-lane reductions, int32 compare,
    # fully unrolled for small L.
    pos = jax.lax.broadcasted_iota(jnp.int32, (B, Vp), 1)             # (B, Vp) int32

    def scatter_step(l, acc):
        att_col = att_ref[:, pl.ds(l, 1)]                             # (B, 1) f32
        idx_col = idx_ref[:, pl.ds(l, 1)]                             # (B, 1) int32
        return acc + jnp.where(pos == idx_col, att_col, 0.0)

    acc0 = jnp.zeros((B, Vp), f32)
    if L <= 32:
        tid = acc0
        for l in range(L):                                            # static unroll
            tid = scatter_step(l, tid)
    else:
        tid = jax.lax.fori_loop(0, L, scatter_step, acc0, unroll=8)

    # ---- stage 5: pointer/generator mixture, single dense (B, Vp) store ----
    pfinal_ref[...] = p_vocab_ext * p_gen + (1.0 - p_gen) * tid


def _fused_step(prep, xh, enc, prev_sum, idx):
    B = xh.shape[0]
    d = prep["dims"]
    H, L, Vp, Vvp = d["H"], d["L"], d["Vp"], d["Vvp"]

    args = (prep["scalars"], xh, enc, prev_sum, idx,
            prep["w_gru"], prep["b_gru"],
            prep["w_h"], prep["w_s"], prep["w_c"], prep["v_att"],
            prep["w_oh_h"], prep["w_oh_c"], prep["b_oh"],
            prep["w_ov_ext"], prep["b_ov_ext"],
            prep["wg_h"], prep["wg_c"], prep["wg_e"])

    vmem = pl.BlockSpec(memory_space=pltpu.MemorySpace.VMEM)
    smem = pl.BlockSpec(memory_space=pltpu.MemorySpace.SMEM)
    in_specs = [smem] + [vmem] * (len(args) - 1)
    out_shape = (jax.ShapeDtypeStruct((B, Vp), jnp.float32),    # p_final (lane-dense, padded)
                 jax.ShapeDtypeStruct((B, Vvp), jnp.float32),   # p_vocab (lane-dense, padded)
                 jax.ShapeDtypeStruct((B, L), jnp.float32),     # att_dist
                 jax.ShapeDtypeStruct((B, 1), jnp.float32),     # p_gen
                 jax.ShapeDtypeStruct((B, H), jnp.float32))     # h_new
    out_specs = (vmem, vmem, vmem, vmem, vmem)

    return pl.pallas_call(
        _fused_kernel,
        out_shape=out_shape,
        in_specs=in_specs,
        out_specs=out_specs,
        compiler_params=pltpu.CompilerParams(
            # explicit scoped-VMEM budget (v5e default is only 16 MiB); the toy-shape
            # single-block head uses <1 MiB, production V-tiles must fit v7x's 64 MiB.
            vmem_limit_bytes=32 * 1024 * 1024),
    )(*args)


# ----------------------------------------------------------------------------
# Parameters (PyTorch __init__ shapes) and one-time kernel-layout preprocessing
# ----------------------------------------------------------------------------
def init_params(key, hidden_size, embedding_size, vocab_size, input_length):
    H, E, V, L = hidden_size, embedding_size, vocab_size, input_length
    ks = jax.random.split(key, 16)
    s = 0.1
    p = dict(
        embedding=jax.random.normal(ks[0], (V, E)) * s,
        gru_w_ih=jax.random.normal(ks[1], (3 * H, E)) * s,
        gru_w_hh=jax.random.normal(ks[2], (3 * H, H)) * s,
        gru_b_ih=jax.random.normal(ks[3], (3 * H,)) * s,
        gru_b_hh=jax.random.normal(ks[4], (3 * H,)) * s,
        w_h=jax.random.normal(ks[5], (H,)) * s,
        w_s=jax.random.normal(ks[6], (H,)) * s,
        w_c=jax.random.normal(ks[7], (L,)) * s,
        att_bias=jax.random.normal(ks[8], (1,)) * s,
        attn_weight_v=jax.random.normal(ks[9], (H,)) * s,
        gen_w=jax.random.normal(ks[10], (1, 2 * H + E)) * s,
        gen_b=jax.random.normal(ks[11], (1,)) * s,
        out_hidden_w=jax.random.normal(ks[12], (E, 2 * H)) * s,
        out_hidden_b=jax.random.normal(ks[13], (E,)) * s,
        out_vocab_w=jax.random.normal(ks[14], (V, E)) * s,
        out_vocab_b=jax.random.normal(ks[15], (V,)) * s,
    )
    return jax.tree_util.tree_map(lambda a: a.astype(jnp.float32), p)


def prepare_params(params):
    """One-time transposes / splits / pads / bf16 casts so the per-step kernel does
    zero weight reshaping and all MXU operands are already in bf16."""
    f32, bf16 = jnp.float32, jnp.bfloat16
    H = params["gru_w_hh"].shape[1]
    E = params["embedding"].shape[1]
    L = params["w_c"].shape[0]
    V = params["out_vocab_w"].shape[0]
    v_ext = V + _VOCAB_PAD
    Vp = _round_up(v_ext, 128)          # lane-dense extended vocab width
    Vvp = min(_round_up(V, 128), Vp)    # lane-dense p_vocab prefix width

    # Fused GRU weight: [emb | h] @ W -> columns [r | z | n_input | n_hidden] (4H wide).
    # PyTorch gate order in gru_w_ih / gru_w_hh rows is (r, z, n).
    w_ih_t = params["gru_w_ih"].T                                      # (E, 3H)
    w_hh_t = params["gru_w_hh"].T                                      # (H, 3H)
    w_gru = jnp.concatenate([
        jnp.concatenate([w_ih_t[:, :2 * H], w_ih_t[:, 2 * H:],
                         jnp.zeros((E, H), f32)], axis=1),
        jnp.concatenate([w_hh_t[:, :2 * H], jnp.zeros((H, H), f32),
                         w_hh_t[:, 2 * H:]], axis=1),
    ], axis=0)                                                         # (E+H, 4H)
    b_gru = jnp.concatenate([
        params["gru_b_ih"][:2 * H] + params["gru_b_hh"][:2 * H],       # r, z biases summed
        params["gru_b_ih"][2 * H:],                                    # n input bias
        params["gru_b_hh"][2 * H:],                                    # n hidden bias
    ]).reshape(1, 4 * H)

    # out_vocab weight padded once to the 128-aligned extended width: zero columns +
    # -1e30 biases (f32) => softmax yields exact zeros in the pointer / alignment region.
    w_ov_t = params["out_vocab_w"].T                                   # (E, V)
    w_ov_ext = jnp.concatenate([w_ov_t, jnp.zeros((E, Vp - V), f32)], axis=1)
    b_ov_ext = jnp.concatenate([params["out_vocab_b"].reshape(1, V),
                                jnp.full((1, Vp - V), _NEG, f32)], axis=1)

    prep = dict(
        embedding=params["embedding"],
        w_gru=w_gru.astype(bf16),                                      # MXU operand
        b_gru=b_gru.astype(f32),
        w_h=params["w_h"].reshape(1, H),
        w_s=params["w_s"].reshape(1, H),
        w_c=params["w_c"].reshape(1, L),
        v_att=params["attn_weight_v"].reshape(1, H),
        w_oh_h=params["out_hidden_w"][:, :H].T.astype(bf16),           # (H, E) MXU operand
        w_oh_c=params["out_hidden_w"][:, H:].T.astype(bf16),           # (H, E) MXU operand
        b_oh=params["out_hidden_b"].reshape(1, E),
        w_ov_ext=w_ov_ext.astype(bf16),                                # (E, Vp) MXU operand
        b_ov_ext=b_ov_ext,                                             # (1, Vp) f32
        wg_h=params["gen_w"][:, :H],
        wg_c=params["gen_w"][:, H:2 * H],
        wg_e=params["gen_w"][:, 2 * H:],
        scalars=jnp.concatenate(
            [params["att_bias"], params["gen_b"]]).astype(f32),        # SMEM f32[2]
        dims=dict(H=int(H), E=int(E), L=int(L), V=int(V),
                  v_ext=int(v_ext), Vp=int(Vp), Vvp=int(Vvp)),
    )
    return prep


# ----------------------------------------------------------------------------
# Forward (mirrors CoverageAttnDecoderRNN.forward)
# ----------------------------------------------------------------------------
def coverage_attn_decoder_forward(prep, input_token, prev_decoder_h_states,
                                  last_hidden, encoder_states, full_input_var,
                                  previous_att, nb_unk_tokens=None, use_cuda=False,
                                  coverage_sum=None):
    B = input_token.shape[0]
    L = encoder_states.shape[1]
    d = prep["dims"]
    V, v_ext = d["V"], d["v_ext"]

    # embedding lookup (plain-JAX glue); nn.Dropout -> eval-mode identity
    emb = prep["embedding"][input_token[:, 0]]                         # (B, E)
    xh = jnp.concatenate([emb, last_hidden], axis=-1)                  # (B, E+H)

    # running coverage sum may be carried by the caller (O(T) instead of O(T^2));
    # otherwise fall back to the module-faithful re-reduction of previous_att.
    if coverage_sum is not None:
        prev_sum = coverage_sum
    elif previous_att is None:
        prev_sum = jnp.zeros((B, L), jnp.float32)
    else:
        prev_sum = jnp.sum(previous_att, axis=1)

    p_final_p, p_vocab_p, att_dist, p_gen, h_new = _fused_step(
        prep, xh, encoder_states, prev_sum, full_input_var)

    # strip the lane-alignment padding (exact zeros) off the dense kernel outputs
    p_final = p_final_p[:, :v_ext]
    p_vocab = p_vocab_p[:, :V]

    new_previous_att = (att_dist[:, None, :] if previous_att is None
                        else jnp.concatenate([previous_att, att_dist[:, None, :]], axis=1))
    return (p_final, p_gen, p_vocab, att_dist, prev_decoder_h_states,
            h_new, new_previous_att)


# ----------------------------------------------------------------------------
# Pure-JAX reference (for verification only)
# ----------------------------------------------------------------------------
def reference_forward(params, input_token, prev_decoder_h_states, last_hidden,
                      encoder_states, full_input_var, previous_att):
    B = input_token.shape[0]
    H = last_hidden.shape[-1]
    V = params["out_vocab_w"].shape[0]
    emb = params["embedding"][input_token[:, 0]]
    gi = emb @ params["gru_w_ih"].T + params["gru_b_ih"]
    gh = last_hidden @ params["gru_w_hh"].T + params["gru_b_hh"]
    r = jax.nn.sigmoid(gi[:, :H] + gh[:, :H])
    z = jax.nn.sigmoid(gi[:, H:2 * H] + gh[:, H:2 * H])
    n = jnp.tanh(gi[:, 2 * H:] + r * gh[:, 2 * H:])
    h_new = (1.0 - z) * n + z * last_hidden
    prev_sum = (jnp.zeros_like(encoder_states[:, :, 0]) if previous_att is None
                else jnp.sum(previous_att, axis=1))
    e = jnp.tanh(params["w_h"] * encoder_states + (params["w_s"] * h_new)[:, None, :]
                 + (params["w_c"] * prev_sum)[:, :, None] + params["att_bias"])
    att = jax.nn.softmax(jnp.sum(params["attn_weight_v"] * e, axis=-1), axis=-1)
    ctx = jnp.sum(att[:, :, None] * encoder_states, axis=1)
    comb = jnp.concatenate([h_new, ctx], axis=-1)
    hid = comb @ params["out_hidden_w"].T + params["out_hidden_b"]
    p_vocab = jax.nn.softmax(hid @ params["out_vocab_w"].T + params["out_vocab_b"], axis=-1)
    p_gen = jax.nn.sigmoid(jnp.concatenate([comb, emb], -1) @ params["gen_w"].T
                           + params["gen_b"])
    v_ext = V + _VOCAB_PAD
    tid = jnp.zeros((B, v_ext), jnp.float32)
    tid = tid.at[jnp.arange(B)[:, None], full_input_var].add(att)
    p_final = jnp.pad(p_vocab * p_gen, ((0, 0), (0, _VOCAB_PAD))) + (1.0 - p_gen) * tid
    return p_final, p_gen, p_vocab, att, h_new


# ----------------------------------------------------------------------------
if __name__ == "__main__":
    B, E, H, V, L = 2, 16, 32, 48, 8          # batch, embed, hidden, vocab, src_len
    key = jax.random.PRNGKey(0)
    kp, k1, k2, k3, k4, k5 = jax.random.split(key, 6)

    params = init_params(kp, hidden_size=H, embedding_size=E, vocab_size=V,
                         input_length=L)
    prep = prepare_params(params)

    input_token = jax.random.randint(k1, (B, 1), 0, V, dtype=jnp.int32)
    last_hidden = jax.random.normal(k2, (B, H), jnp.float32)
    encoder_states = jax.random.normal(k3, (B, L, H), jnp.float32)
    full_input_var = jax.random.randint(k4, (B, L), 0, V + 20, dtype=jnp.int32)
    prev_decoder_h_states = jax.random.normal(k5, (B, 1, H), jnp.float32)

    # first decode step (previous_att is None)
    out1 = coverage_attn_decoder_forward(
        prep, input_token, prev_decoder_h_states, last_hidden, encoder_states,
        full_input_var, previous_att=None, nb_unk_tokens=20, use_cuda=False)
    jax.block_until_ready(out1)

    # second decode step (coverage branch); running coverage sum carried by the caller
    cov_sum1 = out1[3]                                   # == previous_att.sum(1) exactly
    out2 = coverage_attn_decoder_forward(
        prep, input_token, prev_decoder_h_states, out1[5], encoder_states,
        full_input_var, previous_att=out1[6], nb_unk_tokens=20, use_cuda=False,
        coverage_sum=cov_sum1)
    jax.block_until_ready(out2)

    # verify against pure-JAX f32 reference (bf16 MXU weights -> looser tolerance)
    TOL = dict(atol=2e-2, rtol=2e-2)
    for out, prev_att, last_h in ((out1, None, last_hidden), (out2, out1[6], out1[5])):
        ref = reference_forward(params, input_token, prev_decoder_h_states, last_h,
                                encoder_states, full_input_var, prev_att)
        p_final, p_gen, p_vocab, att, _, dec_hidden, _ = out
        np.testing.assert_allclose(p_final, ref[0], **TOL)
        np.testing.assert_allclose(p_gen, ref[1], **TOL)
        np.testing.assert_allclose(p_vocab, ref[2], **TOL)
        np.testing.assert_allclose(att, ref[3], **TOL)
        np.testing.assert_allclose(dec_hidden, ref[4], **TOL)

    print("KERNEL_OK")
</pallas_src>

<mosaic_0001>
module attributes {stable_mosaic.version = 11 : i64} {
  func.func @_fused_kernel(%arg0: memref<2xf32, #tpu.memory_space<smem>>, %arg1: memref<2x48xf32, #tpu.memory_space<vmem>>, %arg2: memref<2x8x32xf32, #tpu.memory_space<vmem>>, %arg3: memref<2x8xf32, #tpu.memory_space<vmem>>, %arg4: memref<2x8xi32, #tpu.memory_space<vmem>>, %arg5: memref<48x128xbf16, #tpu.memory_space<vmem>>, %arg6: memref<1x128xf32, #tpu.memory_space<vmem>>, %arg7: memref<1x32xf32, #tpu.memory_space<vmem>>, %arg8: memref<1x32xf32, #tpu.memory_space<vmem>>, %arg9: memref<1x8xf32, #tpu.memory_space<vmem>>, %arg10: memref<1x32xf32, #tpu.memory_space<vmem>>, %arg11: memref<32x16xbf16, #tpu.memory_space<vmem>>, %arg12: memref<32x16xbf16, #tpu.memory_space<vmem>>, %arg13: memref<1x16xf32, #tpu.memory_space<vmem>>, %arg14: memref<16x1152xbf16, #tpu.memory_space<vmem>>, %arg15: memref<1x1152xf32, #tpu.memory_space<vmem>>, %arg16: memref<1x32xf32, #tpu.memory_space<vmem>>, %arg17: memref<1x32xf32, #tpu.memory_space<vmem>>, %arg18: memref<1x16xf32, #tpu.memory_space<vmem>>, %arg19: memref<2x1152xf32, #tpu.memory_space<vmem>>, %arg20: memref<2x128xf32, #tpu.memory_space<vmem>>, %arg21: memref<2x8xf32, #tpu.memory_space<vmem>>, %arg22: memref<2x1xf32, #tpu.memory_space<vmem>>, %arg23: memref<2x32xf32, #tpu.memory_space<vmem>>) attributes {dimension_semantics = [], scalar_prefetch = 0 : i64, scratch_operands = 0 : i64, tpu.core_type = #tpu.core_type<tc>} {
    %c0 = arith.constant 0 : index
    %c0_0 = arith.constant 0 : index
    %0 = vector.load %arg1[%c0, %c0_0] : memref<2x48xf32, #tpu.memory_space<vmem>>, vector<2x48xf32>
    %1 = vector.extract_strided_slice %0 {offsets = [0, 0], sizes = [2, 16], strides = [1, 1]} : vector<2x48xf32> to vector<2x16xf32>
    %2 = vector.extract_strided_slice %0 {offsets = [0, 16], sizes = [2, 32], strides = [1, 1]} : vector<2x48xf32> to vector<2x32xf32>
    %3 = arith.truncf %0 : vector<2x48xf32> to vector<2x48xbf16>
    %c0_1 = arith.constant 0 : index
    %c0_2 = arith.constant 0 : index
    %4 = vector.load %arg5[%c0_1, %c0_2] : memref<48x128xbf16, #tpu.memory_space<vmem>>, vector<48x128xbf16>
    %cst = arith.constant dense<0.000000e+00> : vector<2x128xf32>
    %5 = tpu.matmul %3, %4, %cst {dimension_numbers = #tpu.dot_dimension_numbers<[1], [0], [0], [1], [0, 0, 1, 1], [], []>} : vector<2x48xbf16>, vector<48x128xbf16>, vector<2x128xf32> -> vector<2x128xf32>
    %c0_3 = arith.constant 0 : index
    %c0_4 = arith.constant 0 : index
    %6 = vector.load %arg6[%c0_3, %c0_4] : memref<1x128xf32, #tpu.memory_space<vmem>>, vector<1x128xf32>
    %7 = vector.broadcast %6 : vector<1x128xf32> to vector<2x128xf32>
    %8 = arith.addf %5, %7 : vector<2x128xf32>
    %9 = vector.extract_strided_slice %8 {offsets = [0, 0], sizes = [2, 32], strides = [1, 1]} : vector<2x128xf32> to vector<2x32xf32>
    %10 = arith.negf %9 : vector<2x32xf32>
    %11 = math.exp %10 : vector<2x32xf32>
    %cst_5 = arith.constant 1.000000e+00 : f32
    %12 = vector.broadcast %cst_5 : f32 to vector<2x32xf32>
    %13 = arith.addf %12, %11 : vector<2x32xf32>
    %14 = arith.divf %12, %13 : vector<2x32xf32>
    %15 = vector.extract_strided_slice %8 {offsets = [0, 32], sizes = [2, 32], strides = [1, 1]} : vector<2x128xf32> to vector<2x32xf32>
    %16 = arith.negf %15 : vector<2x32xf32>
    %17 = math.exp %16 : vector<2x32xf32>
    %cst_6 = arith.constant 1.000000e+00 : f32
    %18 = vector.broadcast %cst_6 : f32 to vector<2x32xf32>
    %19 = arith.addf %18, %17 : vector<2x32xf32>
    %20 = arith.divf %18, %19 : vector<2x32xf32>
    %21 = vector.extract_strided_slice %8 {offsets = [0, 64], sizes = [2, 32], strides = [1, 1]} : vector<2x128xf32> to vector<2x32xf32>
    %22 = vector.extract_strided_slice %8 {offsets = [0, 96], sizes = [2, 32], strides = [1, 1]} : vector<2x128xf32> to vector<2x32xf32>
    %23 = arith.mulf %14, %22 : vector<2x32xf32>
    %24 = arith.addf %21, %23 : vector<2x32xf32>
    %25 = math.tanh %24 : vector<2x32xf32>
    %cst_7 = arith.constant 1.000000e+00 : f32
    %26 = vector.broadcast %cst_7 : f32 to vector<2x32xf32>
    %27 = arith.subf %26, %20 : vector<2x32xf32>
    %28 = arith.mulf %27, %25 : vector<2x32xf32>
    %29 = arith.mulf %20, %2 : vector<2x32xf32>
    %30 = arith.addf %28, %29 : vector<2x32xf32>
    %c0_8 = arith.constant 0 : index
    %c0_9 = arith.constant 0 : index
    %31 = vector.load %arg23[%c0_8, %c0_9] : memref<2x32xf32, #tpu.memory_space<vmem>>, vector<2x32xf32>
    tpu.vector_store %arg23[%c0_8, %c0_9], %30 {strides = array<i32>} : memref<2x32xf32, #tpu.memory_space<vmem>>, vector<2x32xf32>,
    %c0_10 = arith.constant 0 : index
    %c0_11 = arith.constant 0 : index
    %c0_12 = arith.constant 0 : index
    %32 = vector.load %arg2[%c0_10, %c0_11, %c0_12] : memref<2x8x32xf32, #tpu.memory_space<vmem>>, vector<2x8x32xf32>
    %c0_13 = arith.constant 0 : index
    %33 = memref.load %arg0[%c0_13] : memref<2xf32, #tpu.memory_space<smem>>
    %c0_14 = arith.constant 0 : index
    %c0_15 = arith.constant 0 : index
    %34 = vector.load %arg9[%c0_14, %c0_15] : memref<1x8xf32, #tpu.memory_space<vmem>>, vector<1x8xf32>
    %c0_16 = arith.constant 0 : index
    %c0_17 = arith.constant 0 : index
    %35 = vector.load %arg3[%c0_16, %c0_17] : memref<2x8xf32, #tpu.memory_space<vmem>>, vector<2x8xf32>
    %36 = vector.broadcast %34 : vector<1x8xf32> to vector<2x8xf32>
    %37 = arith.mulf %36, %35 : vector<2x8xf32>
    %c0_18 = arith.constant 0 : index
    %c0_19 = arith.constant 0 : index
    %38 = vector.load %arg7[%c0_18, %c0_19] : memref<1x32xf32, #tpu.memory_space<vmem>>, vector<1x32xf32>
    %39 = vector.shape_cast %38 : vector<1x32xf32> to vector<1x1x32xf32>
    %40 = vector.broadcast %39 : vector<1x1x32xf32> to vector<2x8x32xf32>
    %41 = arith.mulf %40, %32 : vector<2x8x32xf32>
    %c0_20 = arith.constant 0 : index
    %c0_21 = arith.constant 0 : index
    %42 = vector.load %arg8[%c0_20, %c0_21] : memref<1x32xf32, #tpu.memory_space<vmem>>, vector<1x32xf32>
    %43 = vector.broadcast %42 : vector<1x32xf32> to vector<2x32xf32>
    %44 = arith.mulf %43, %30 : vector<2x32xf32>
    %45 = vector.shape_cast %44 : vector<2x32xf32> to vector<2x1x32xf32>
    %46 = vector.broadcast %45 : vector<2x1x32xf32> to vector<2x8x32xf32>
    %47 = arith.addf %41, %46 : vector<2x8x32xf32>
    %48 = vector.shape_cast %37 : vector<2x8xf32> to vector<2x8x1xf32>
    %49 = vector.broadcast %48 : vector<2x8x1xf32> to vector<2x8x32xf32>
    %50 = arith.addf %47, %49 : vector<2x8x32xf32>
    %51 = vector.broadcast %33 : f32 to vector<2x8x32xf32>
    %52 = arith.addf %50, %51 : vector<2x8x32xf32>
    %53 = math.tanh %52 : vector<2x8x32xf32>
    %c0_22 = arith.constant 0 : index
    %c0_23 = arith.constant 0 : index
    %54 = vector.load %arg10[%c0_22, %c0_23] : memref<1x32xf32, #tpu.memory_space<vmem>>, vector<1x32xf32>
    %55 = vector.shape_cast %54 : vector<1x32xf32> to vector<1x1x32xf32>
    %56 = vector.broadcast %55 : vector<1x1x32xf32> to vector<2x8x32xf32>
    %57 = arith.mulf %56, %53 : vector<2x8x32xf32>
    %cst_24 = arith.constant dense<0.000000e+00> : vector<2x8xf32>
    %58 = vector.multi_reduction <add>, %57, %cst_24 [2] : vector<2x8x32xf32> to vector<2x8xf32>
    %cst_25 = arith.constant dense<0xFF800000> : vector<2xf32>
    %59 = vector.multi_reduction <maximumf>, %58, %cst_25 [1] : vector<2x8xf32> to vector<2xf32>
    %60 = vector.shape_cast %59 : vector<2xf32> to vector<2x1xf32>
    %61 = vector.broadcast %60 : vector<2x1xf32> to vector<2x8xf32>
    %62 = arith.subf %58, %61 : vector<2x8xf32>
    %63 = math.exp %62 : vector<2x8xf32>
    %cst_26 = arith.constant dense<0.000000e+00> : vector<2xf32>
    %64 = vector.multi_reduction <add>, %63, %cst_26 [1] : vector<2x8xf32> to vector<2xf32>
    %65 = vector.shape_cast %64 : vector<2xf32> to vector<2x1xf32>
    %66 = tpu.reciprocal %65 : vector<2x1xf32> -> vector<2x1xf32>
    %67 = vector.broadcast %66 : vector<2x1xf32> to vector<2x8xf32>
    %68 = arith.mulf %63, %67 : vector<2x8xf32>
    %c0_27 = arith.constant 0 : index
    %c0_28 = arith.constant 0 : index
    %69 = vector.load %arg21[%c0_27, %c0_28] : memref<2x8xf32, #tpu.memory_space<vmem>>, vector<2x8xf32>
    tpu.vector_store %arg21[%c0_27, %c0_28], %68 {strides = array<i32>} : memref<2x8xf32, #tpu.memory_space<vmem>>, vector<2x8xf32>,
    %70 = vector.shape_cast %68 : vector<2x8xf32> to vector<2x8x1xf32>
    %71 = vector.broadcast %70 : vector<2x8x1xf32> to vector<2x8x32xf32>
    %72 = arith.mulf %71, %32 : vector<2x8x32xf32>
    %cst_29 = arith.constant dense<0.000000e+00> : vector<2x32xf32>
    %73 = vector.multi_reduction <add>, %72, %cst_29 [1] : vector<2x8x32xf32> to vector<2x32xf32>
    %74 = arith.truncf %30 : vector<2x32xf32> to vector<2x32xbf16>
    %c0_30 = arith.constant 0 : index
    %c0_31 = arith.constant 0 : index
    %75 = vector.load %arg11[%c0_30, %c0_31] : memref<32x16xbf16, #tpu.memory_space<vmem>>, vector<32x16xbf16>
    %cst_32 = arith.constant dense<0.000000e+00> : vector<2x16xf32>
    %76 = tpu.matmul %74, %75, %cst_32 {dimension_numbers = #tpu.dot_dimension_numbers<[1], [0], [0], [1], [0, 0, 1, 1], [], []>} : vector<2x32xbf16>, vector<32x16xbf16>, vector<2x16xf32> -> vector<2x16xf32>
    %77 = arith.truncf %73 : vector<2x32xf32> to vector<2x32xbf16>
    %c0_33 = arith.constant 0 : index
    %c0_34 = arith.constant 0 : index
    %78 = vector.load %arg12[%c0_33, %c0_34] : memref<32x16xbf16, #tpu.memory_space<vmem>>, vector<32x16xbf16>
    %cst_35 = arith.constant dense<0.000000e+00> : vector<2x16xf32>
    %79 = tpu.matmul %77, %78, %cst_35 {dimension_numbers = #tpu.dot_dimension_numbers<[1], [0], [0], [1], [0, 0, 1, 1], [], []>} : vector<2x32xbf16>, vector<32x16xbf16>, vector<2x16xf32> -> vector<2x16xf32>
    %80 = arith.addf %76, %79 : vector<2x16xf32>
    %c0_36 = arith.constant 0 : index
    %c0_37 = arith.constant 0 : index
    %81 = vector.load %arg13[%c0_36, %c0_37] : memref<1x16xf32, #tpu.memory_space<vmem>>, vector<1x16xf32>
    %82 = vector.broadcast %81 : vector<1x16xf32> to vector<2x16xf32>
    %83 = arith.addf %80, %82 : vector<2x16xf32>
    %84 = arith.truncf %83 : vector<2x16xf32> to vector<2x16xbf16>
    %c0_38 = arith.constant 0 : index
    %c0_39 = arith.constant 0 : index
    %85 = vector.load %arg14[%c0_38, %c0_39] : memref<16x1152xbf16, #tpu.memory_space<vmem>>, vector<16x1152xbf16>
    %cst_40 = arith.constant dense<0.000000e+00> : vector<2x1152xf32>
    %86 = tpu.matmul %84, %85, %cst_40 {dimension_numbers = #tpu.dot_dimension_numbers<[1], [0], [0], [1], [0, 0, 1, 1], [], []>} : vector<2x16xbf16>, vector<16x1152xbf16>, vector<2x1152xf32> -> vector<2x1152xf32>
    %c0_41 = arith.constant 0 : index
    %c0_42 = arith.constant 0 : index
    %87 = vector.load %arg15[%c0_41, %c0_42] : memref<1x1152xf32, #tpu.memory_space<vmem>>, vector<1x1152xf32>
    %88 = vector.broadcast %87 : vector<1x1152xf32> to vector<2x1152xf32>
    %89 = arith.addf %86, %88 : vector<2x1152xf32>
    %cst_43 = arith.constant dense<0xFF800000> : vector<2xf32>
    %90 = vector.multi_reduction <maximumf>, %89, %cst_43 [1] : vector<2x1152xf32> to vector<2xf32>
    %91 = vector.shape_cast %90 : vector<2xf32> to vector<2x1xf32>
    %92 = vector.broadcast %91 : vector<2x1xf32> to vector<2x1152xf32>
    %93 = arith.subf %89, %92 : vector<2x1152xf32>
    %94 = math.exp %93 : vector<2x1152xf32>
    %cst_44 = arith.constant dense<0.000000e+00> : vector<2xf32>
    %95 = vector.multi_reduction <add>, %94, %cst_44 [1] : vector<2x1152xf32> to vector<2xf32>
    %96 = vector.shape_cast %95 : vector<2xf32> to vector<2x1xf32>
    %97 = tpu.reciprocal %96 : vector<2x1xf32> -> vector<2x1xf32>
    %98 = vector.broadcast %97 : vector<2x1xf32> to vector<2x1152xf32>
    %99 = arith.mulf %94, %98 : vector<2x1152xf32>
    %100 = vector.extract_strided_slice %99 {offsets = [0, 0], sizes = [2, 128], strides = [1, 1]} : vector<2x1152xf32> to vector<2x128xf32>
    %c0_45 = arith.constant 0 : index
    %c0_46 = arith.constant 0 : index
    %101 = vector.load %arg20[%c0_45, %c0_46] : memref<2x128xf32, #tpu.memory_space<vmem>>, vector<2x128xf32>
    tpu.vector_store %arg20[%c0_45, %c0_46], %100 {strides = array<i32>} : memref<2x128xf32, #tpu.memory_space<vmem>>, vector<2x128xf32>,
    %c1 = arith.constant 1 : index
    %102 = memref.load %arg0[%c1] : memref<2xf32, #tpu.memory_space<smem>>
    %c0_47 = arith.constant 0 : index
    %c0_48 = arith.constant 0 : index
    %103 = vector.load %arg16[%c0_47, %c0_48] : memref<1x32xf32, #tpu.memory_space<vmem>>, vector<1x32xf32>
    %104 = vector.broadcast %103 : vector<1x32xf32> to vector<2x32xf32>
    %105 = arith.mulf %30, %104 : vector<2x32xf32>
    %cst_49 = arith.constant dense<0.000000e+00> : vector<2xf32>
    %106 = vector.multi_reduction <add>, %105, %cst_49 [1] : vector<2x32xf32> to vector<2xf32>
    %107 = vector.shape_cast %106 : vector<2xf32> to vector<2x1xf32>
    %c0_50 = arith.constant 0 : index
    %c0_51 = arith.constant 0 : index
    %108 = vector.load %arg17[%c0_50, %c0_51] : memref<1x32xf32, #tpu.memory_space<vmem>>, vector<1x32xf32>
    %109 = vector.broadcast %108 : vector<1x32xf32> to vector<2x32xf32>
    %110 = arith.mulf %73, %109 : vector<2x32xf32>
    %cst_52 = arith.constant dense<0.000000e+00> : vector<2xf32>
    %111 = vector.multi_reduction <add>, %110, %cst_52 [1] : vector<2x32xf32> to vector<2xf32>
    %112 = vector.shape_cast %111 : vector<2xf32> to vector<2x1xf32>
    %113 = arith.addf %107, %112 : vector<2x1xf32>
    %c0_53 = arith.constant 0 : index
    %c0_54 = arith.constant 0 : index
    %114 = vector.load %arg18[%c0_53, %c0_54] : memref<1x16xf32, #tpu.memory_space<vmem>>, vector<1x16xf32>
    %115 = vector.broadcast %114 : vector<1x16xf32> to vector<2x16xf32>
    %116 = arith.mulf %1, %115 : vector<2x16xf32>
    %cst_55 = arith.constant dense<0.000000e+00> : vector<2xf32>
    %117 = vector.multi_reduction <add>, %116, %cst_55 [1] : vector<2x16xf32> to vector<2xf32>
    %118 = vector.shape_cast %117 : vector<2xf32> to vector<2x1xf32>
    %119 = arith.addf %113, %118 : vector<2x1xf32>
    %120 = vector.broadcast %102 : f32 to vector<2x1xf32>
    %121 = arith.addf %119, %120 : vector<2x1xf32>
    %122 = arith.negf %121 : vector<2x1xf32>
    %123 = math.exp %122 : vector<2x1xf32>
    %cst_56 = arith.constant 1.000000e+00 : f32
    %124 = vector.broadcast %cst_56 : f32 to vector<2x1xf32>
    %125 = arith.addf %124, %123 : vector<2x1xf32>
    %126 = arith.divf %124, %125 : vector<2x1xf32>
    %c0_57 = arith.constant 0 : index
    %c0_58 = arith.constant 0 : index
    %127 = vector.load %arg22[%c0_57, %c0_58] : memref<2x1xf32, #tpu.memory_space<vmem>>, vector<2x1xf32>
    tpu.vector_store %arg22[%c0_57, %c0_58], %126 {strides = array<i32>} : memref<2x1xf32, #tpu.memory_space<vmem>>, vector<2x1xf32>,
    %128 = tpu.iota {dimensions = array<i32: 1>} : vector<2x1152xi32>
    %cst_59 = arith.constant 0.000000e+00 : f32
    %129 = vector.broadcast %cst_59 : f32 to vector<2x1152xf32>
    %c0_60 = arith.constant 0 : index
    %c0_61 = arith.constant 0 : index
    %130 = vector.load %arg21[%c0_60, %c0_61] : memref<2x8xf32, #tpu.memory_space<vmem>>, vector<2x1xf32>
    %c0_62 = arith.constant 0 : index
    %c0_63 = arith.constant 0 : index
    %131 = vector.load %arg4[%c0_62, %c0_63] : memref<2x8xi32, #tpu.memory_space<vmem>>, vector<2x1xi32>
    %132 = vector.broadcast %131 : vector<2x1xi32> to vector<2x1152xi32>
    %133 = arith.cmpi eq, %128, %132 : vector<2x1152xi32>
    %cst_64 = arith.constant 0.000000e+00 : f32
    %134 = vector.shape_cast %130 : vector<2x1xf32> to vector<2x1xf32>
    %135 = vector.broadcast %134 : vector<2x1xf32> to vector<2x1152xf32>
    %136 = vector.broadcast %cst_64 : f32 to vector<2x1152xf32>
    %137 = arith.select %133, %135, %136 : vector<2x1152xi1>, vector<2x1152xf32>
    %138 = arith.addf %129, %137 : vector<2x1152xf32>
    %c0_65 = arith.constant 0 : index
    %c1_66 = arith.constant 1 : index
    %139 = vector.load %arg21[%c0_65, %c1_66] : memref<2x8xf32, #tpu.memory_space<vmem>>, vector<2x1xf32>
    %c0_67 = arith.constant 0 : index
    %c1_68 = arith.constant 1 : index
    %140 = vector.load %arg4[%c0_67, %c1_68] : memref<2x8xi32, #tpu.memory_space<vmem>>, vector<2x1xi32>
    %141 = vector.broadcast %140 : vector<2x1xi32> to vector<2x1152xi32>
    %142 = arith.cmpi eq, %128, %141 : vector<2x1152xi32>
    %cst_69 = arith.constant 0.000000e+00 : f32
    %143 = vector.shape_cast %139 : vector<2x1xf32> to vector<2x1xf32>
    %144 = vector.broadcast %143 : vector<2x1xf32> to vector<2x1152xf32>
    %145 = vector.broadcast %cst_69 : f32 to vector<2x1152xf32>
    %146 = arith.select %142, %144, %145 : vector<2x1152xi1>, vector<2x1152xf32>
    %147 = arith.addf %138, %146 : vector<2x1152xf32>
    %c0_70 = arith.constant 0 : index
    %c2 = arith.constant 2 : index
    %148 = vector.load %arg21[%c0_70, %c2] : memref<2x8xf32, #tpu.memory_space<vmem>>, vector<2x1xf32>
    %c0_71 = arith.constant 0 : index
    %c2_72 = arith.constant 2 : index
    %149 = vector.load %arg4[%c0_71, %c2_72] : memref<2x8xi32, #tpu.memory_space<vmem>>, vector<2x1xi32>
    %150 = vector.broadcast %149 : vector<2x1xi32> to vector<2x1152xi32>
    %151 = arith.cmpi eq, %128, %150 : vector<2x1152xi32>
    %cst_73 = arith.constant 0.000000e+00 : f32
    %152 = vector.shape_cast %148 : vector<2x1xf32> to vector<2x1xf32>
    %153 = vector.broadcast %152 : vector<2x1xf32> to vector<2x1152xf32>
    %154 = vector.broadcast %cst_73 : f32 to vector<2x1152xf32>
    %155 = arith.select %151, %153, %154 : vector<2x1152xi1>, vector<2x1152xf32>
    %156 = arith.addf %147, %155 : vector<2x1152xf32>
    %c0_74 = arith.constant 0 : index
    %c3 = arith.constant 3 : index
    %157 = vector.load %arg21[%c0_74, %c3] : memref<2x8xf32, #tpu.memory_space<vmem>>, vector<2x1xf32>
    %c0_75 = arith.constant 0 : index
    %c3_76 = arith.constant 3 : index
    %158 = vector.load %arg4[%c0_75, %c3_76] : memref<2x8xi32, #tpu.memory_space<vmem>>, vector<2x1xi32>
    %159 = vector.broadcast %158 : vector<2x1xi32> to vector<2x1152xi32>
    %160 = arith.cmpi eq, %128, %159 : vector<2x1152xi32>
    %cst_77 = arith.constant 0.000000e+00 : f32
    %161 = vector.shape_cast %157 : vector<2x1xf32> to vector<2x1xf32>
    %162 = vector.broadcast %161 : vector<2x1xf32> to vector<2x1152xf32>
    %163 = vector.broadcast %cst_77 : f32 to vector<2x1152xf32>
    %164 = arith.select %160, %162, %163 : vector<2x1152xi1>, vector<2x1152xf32>
    %165 = arith.addf %156, %164 : vector<2x1152xf32>
    %c0_78 = arith.constant 0 : index
    %c4 = arith.constant 4 : index
    %166 = vector.load %arg21[%c0_78, %c4] : memref<2x8xf32, #tpu.memory_space<vmem>>, vector<2x1xf32>
    %c0_79 = arith.constant 0 : index
    %c4_80 = arith.constant 4 : index
    %167 = vector.load %arg4[%c0_79, %c4_80] : memref<2x8xi32, #tpu.memory_space<vmem>>, vector<2x1xi32>
    %168 = vector.broadcast %167 : vector<2x1xi32> to vector<2x1152xi32>
    %169 = arith.cmpi eq, %128, %168 : vector<2x1152xi32>
    %cst_81 = arith.constant 0.000000e+00 : f32
    %170 = vector.shape_cast %166 : vector<2x1xf32> to vector<2x1xf32>
    %171 = vector.broadcast %170 : vector<2x1xf32> to vector<2x1152xf32>
    %172 = vector.broadcast %cst_81 : f32 to vector<2x1152xf32>
    %173 = arith.select %169, %171, %172 : vector<2x1152xi1>, vector<2x1152xf32>
    %174 = arith.addf %165, %173 : vector<2x1152xf32>
    %c0_82 = arith.constant 0 : index
    %c5 = arith.constant 5 : index
    %175 = vector.load %arg21[%c0_82, %c5] : memref<2x8xf32, #tpu.memory_space<vmem>>, vector<2x1xf32>
    %c0_83 = arith.constant 0 : index
    %c5_84 = arith.constant 5 : index
    %176 = vector.load %arg4[%c0_83, %c5_84] : memref<2x8xi32, #tpu.memory_space<vmem>>, vector<2x1xi32>
    %177 = vector.broadcast %176 : vector<2x1xi32> to vector<2x1152xi32>
    %178 = arith.cmpi eq, %128, %177 : vector<2x1152xi32>
    %cst_85 = arith.constant 0.000000e+00 : f32
    %179 = vector.shape_cast %175 : vector<2x1xf32> to vector<2x1xf32>
    %180 = vector.broadcast %179 : vector<2x1xf32> to vector<2x1152xf32>
    %181 = vector.broadcast %cst_85 : f32 to vector<2x1152xf32>
    %182 = arith.select %178, %180, %181 : vector<2x1152xi1>, vector<2x1152xf32>
    %183 = arith.addf %174, %182 : vector<2x1152xf32>
    %c0_86 = arith.constant 0 : index
    %c6 = arith.constant 6 : index
    %184 = vector.load %arg21[%c0_86, %c6] : memref<2x8xf32, #tpu.memory_space<vmem>>, vector<2x1xf32>
    %c0_87 = arith.constant 0 : index
    %c6_88 = arith.constant 6 : index
    %185 = vector.load %arg4[%c0_87, %c6_88] : memref<2x8xi32, #tpu.memory_space<vmem>>, vector<2x1xi32>
    %186 = vector.broadcast %185 : vector<2x1xi32> to vector<2x1152xi32>
    %187 = arith.cmpi eq, %128, %186 : vector<2x1152xi32>
    %cst_89 = arith.constant 0.000000e+00 : f32
    %188 = vector.shape_cast %184 : vector<2x1xf32> to vector<2x1xf32>
    %189 = vector.broadcast %188 : vector<2x1xf32> to vector<2x1152xf32>
    %190 = vector.broadcast %cst_89 : f32 to vector<2x1152xf32>
    %191 = arith.select %187, %189, %190 : vector<2x1152xi1>, vector<2x1152xf32>
    %192 = arith.addf %183, %191 : vector<2x1152xf32>
    %c0_90 = arith.constant 0 : index
    %c7 = arith.constant 7 : index
    %193 = vector.load %arg21[%c0_90, %c7] : memref<2x8xf32, #tpu.memory_space<vmem>>, vector<2x1xf32>
    %c0_91 = arith.constant 0 : index
    %c7_92 = arith.constant 7 : index
    %194 = vector.load %arg4[%c0_91, %c7_92] : memref<2x8xi32, #tpu.memory_space<vmem>>, vector<2x1xi32>
    %195 = vector.broadcast %194 : vector<2x1xi32> to vector<2x1152xi32>
    %196 = arith.cmpi eq, %128, %195 : vector<2x1152xi32>
    %cst_93 = arith.constant 0.000000e+00 : f32
    %197 = vector.shape_cast %193 : vector<2x1xf32> to vector<2x1xf32>
    %198 = vector.broadcast %197 : vector<2x1xf32> to vector<2x1152xf32>
    %199 = vector.broadcast %cst_93 : f32 to vector<2x1152xf32>
    %200 = arith.select %196, %198, %199 : vector<2x1152xi1>, vector<2x1152xf32>
    %201 = arith.addf %192, %200 : vector<2x1152xf32>
    %202 = vector.broadcast %126 : vector<2x1xf32> to vector<2x1152xf32>
    %203 = arith.mulf %99, %202 : vector<2x1152xf32>
    %cst_94 = arith.constant 1.000000e+00 : f32
    %204 = vector.broadcast %cst_94 : f32 to vector<2x1xf32>
    %205 = arith.subf %204, %126 : vector<2x1xf32>
    %206 = vector.broadcast %205 : vector<2x1xf32> to vector<2x1152xf32>
    %207 = arith.mulf %206, %201 : vector<2x1152xf32>
    %208 = arith.addf %203, %207 : vector<2x1152xf32>
    %c0_95 = arith.constant 0 : index
    %c0_96 = arith.constant 0 : index
    %209 = vector.load %arg19[%c0_95, %c0_96] : memref<2x1152xf32, #tpu.memory_space<vmem>>, vector<2x1152xf32>
    tpu.vector_store %arg19[%c0_95, %c0_96], %208 {strides = array<i32>} : memref<2x1152xf32, #tpu.memory_space<vmem>>, vector<2x1152xf32>,
    return
  }
}

</mosaic_0001>

<bundles_post_ra>
// kernel: tpu_custom_call.1
= control target key start
LH: loop header
LB: loop body
LE: loop exit
PB: predicated region body
PF: predicated region fallthrough
CT: control target
= control target key end

     0   :  { %s3015_s0 = inlined_call_operand.hbm [shape: f32[2], index: 0, kind: input, shape index: {}]   ;;  %s3016_s1 = inlined_call_operand.vmem [shape: f32[2,48], index: 1, kind: input, shape index: {}]   ;;  %s3017_s2 = inlined_call_operand.hbm [shape: f32[2,8,32], index: 2, kind: input, shape index: {}]   ;;  %s3018_s3 = inlined_call_operand.vmem [shape: f32[2,8], index: 3, kind: input, shape index: {}]   ;;  %s3019_s4 = inlined_call_operand.hbm [shape: s32[2,8], index: 4, kind: input, shape index: {}]   ;;  %s3020_s5 = inlined_call_operand.vmem [shape: bf16[48,128], index: 5, kind: input, shape index: {}]   ;;  %s3021_s6 = inlined_call_operand.hbm [shape: f32[1,128], index: 6, kind: input, shape index: {}]   ;;  %s3022_s7 = inlined_call_operand.hbm [shape: f32[1,32], index: 7, kind: input, shape index: {}]   ;;  %s3023_s8 = inlined_call_operand.hbm [shape: f32[1,32], index: 8, kind: input, shape index: {}]   ;;  %s3024_s9 = inlined_call_operand.hbm [shape: f32[1,8], index: 9, kind: input, shape index: {}]   ;;  %s3025_s10 = inlined_call_operand.hbm [shape: f32[1,32], index: 10, kind: input, shape index: {}]   ;;  %s3026_s11 = inlined_call_operand.vmem [shape: bf16[32,16], index: 11, kind: input, shape index: {}]   ;;  %s3027_s12 = inlined_call_operand.vmem [shape: bf16[32,16], index: 12, kind: input, shape index: {}]   ;;  %s3028_s13 = inlined_call_operand.hbm [shape: f32[1,16], index: 13, kind: input, shape index: {}]   ;;  %s3029_s14 = inlined_call_operand.vmem [shape: bf16[16,1152], index: 14, kind: input, shape index: {}]   ;;  %s3030_s15 = inlined_call_operand.hbm [shape: f32[1,1152], index: 15, kind: input, shape index: {}]   ;;  %s3031_s16 = inlined_call_operand.vmem [shape: f32[1,32], index: 16, kind: input, shape index: {}]   ;;  %s3032_s17 = inlined_call_operand.vmem [shape: f32[1,32], index: 17, kind: input, shape index: {}]   ;;  %s3033_s18 = inlined_call_operand.vmem [shape: f32[1,16], index: 18, kind: input, shape index: {}]   ;;  %s3034_s19 = inlined_call_operand.hbm [shape: f32[2,1152], index: 19, kind: output, shape index: {0}]   ;;  %s3035_s20 = inlined_call_operand.hbm [shape: f32[2,128], index: 20, kind: output, shape index: {1}]   ;;  %s3036_s21 = inlined_call_operand.hbm [shape: f32[2,8], index: 21, kind: output, shape index: {2}]   ;;  %s3037_s22 = inlined_call_operand.vmem [shape: f32[2,1], index: 22, kind: output, shape index: {3}]   ;;  %s3038_s23 = inlined_call_operand.hbm [shape: f32[2,32], index: 23, kind: output, shape index: {4}]  }
   0x1   :  { %3046 = sst [smem:[#allocation39_spill]] %s3015_s0 }
   0x2   :  { %3047 = sst [smem:[#allocation40_spill]] %s3016_s1 }
   0x3   :  { %3048 = sst [smem:[#allocation41_spill]] %s3017_s2 }
   0x4   :  { %3049 = sst [smem:[#allocation42_spill]] %s3018_s3 }
   0x5   :  { %3050 = sst [smem:[#allocation43_spill]] %s3019_s4 }
   0x6   :  { %3051 = sst [smem:[#allocation44_spill]] %s3020_s5 }
   0x7   :  { %3052 = sst [smem:[#allocation45_spill]] %s3021_s6 }
   0x8   :  { %3053 = sst [smem:[#allocation46_spill]] %s3022_s7 }
   0x9   :  { %3054 = sst [smem:[#allocation47_spill]] %s3034_s19 }
   0xa   :  { %29 = vsyncpa [#allocation5], 0 }
   0xb   :  { %30 = vsyncpa [#allocation3], 0 }
   0xc   :  { %31 = vsyncpa [#allocation8], 0 }
   0xd   :  { %32 = vsyncpa [#allocation11], 0 }
   0xe   :  { %33 = vsyncpa [#allocation14], 0 }
   0xf   :  { %34 = vsyncpa [#allocation17], 0 }
  0x10   :  { %35 = vsyncpa [#allocation4], 0 }
  0x11   :  { %36 = vsyncpa [#allocation21], 0 }
  0x12   :  { %37 = vsyncpa [#allocation24], 0  ;;  %s2031_s4 = smov [#allocation7]   ;;  %s2032_s24 = smov [#allocation10]  }
  0x13   :  { %s68_s30 = sshll.u32 %s2031_s4, 4  ;;  %s90_s25 = sshll.u32 %s2032_s24, 4  ;;  %s69_s30 = int_to_ptr.vmem [resolvable:$true] %s68_s30  ;;  %s91_s25 = int_to_ptr.vmem [resolvable:$true] %s90_s25 }
  0x14   :  { %s3055_s26 = sld [smem:[#allocation43_spill]] }
  0x1a   :  { %s1717_s2 = scalar_lea.hbm %s3055_s26, 32 }
  0x1b   :  { %p1718_p0 = scmp.ne.s32.totalorder %s3055_s26, %s1717_s2  ;;  %p1721_p1 = scmp.lt.u32.totalorder %s1717_s2, %s3055_s26 }
  0x1d   :  { %p1723_p2 = pnand %p1721_p1, %p1718_p0 }
  0x1f   :  { %1726 = shalt.err (!%p1723_p2)
}
  0x20   :  { %s1727_s29 = scalar_lea.vmem %s69_s30, 32  ;;  %p1732_p4 = scmp.lt.s32.totalorder %s69_s30, %s69_s30 }
  0x21   :  { %p1728_p3 = scmp.ne.s32.totalorder %s69_s30, %s1727_s29  ;;  %p1733_p5 = scmp.lt.s32.totalorder %s1727_s29, %s1727_s29 }
  0x23   :  { %p1734_p6 = por %p1733_p5, %p1732_p4 }
  0x25   :  { %p1735_p7 = pnand %p1734_p6, %p1728_p3 }
  0x27   :  { %1738 = shalt.err (!%p1735_p7)
}
  0x28   :  { %71 = dma.hbm_to_vmem [thread:$0]  %s3055_s26, 32, %s69_s30, [#allocation8]  }
  0x29   :  { %s3056_s5 = sld [smem:[#allocation46_spill]] }
  0x2f   :  { %s1739_s1 = scalar_lea.hbm %s3056_s5, 16 }
  0x30   :  { %p1740_p8 = scmp.ne.s32.totalorder %s3056_s5, %s1739_s1  ;;  %p1743_p9 = scmp.lt.u32.totalorder %s1739_s1, %s3056_s5 }
  0x32   :  { %p1745_p10 = pnand %p1743_p9, %p1740_p8 }
  0x34   :  { %1748 = shalt.err (!%p1745_p10)
}
  0x35   :  { %s1749_s28 = scalar_lea.vmem %s91_s25, 16  ;;  %s1753_s29 = scalar_lea.vmem %s91_s25, 32 }
  0x36   :  { %p1750_p11 = scmp.ne.s32.totalorder %s91_s25, %s1749_s28  ;;  %p1754_p12 = scmp.lt.s32.totalorder %s91_s25, %s91_s25 }
  0x37   :  { %p1755_p13 = scmp.lt.s32.totalorder %s1753_s29, %s1749_s28 }
  0x39   :  { %p1756_p0 = por %p1755_p13, %p1754_p12 }
  0x3b   :  { %p1757_p1 = pnand %p1756_p0, %p1750_p11 }
  0x3d   :  { %1760 = shalt.err (!%p1757_p1)
}
  0x3e   :  { %93 = dma.hbm_to_vmem [thread:$0]  %s3056_s5, 16, %s91_s25, [#allocation11]  }
  0x3f   :  { %s2033_s3 = smov [#allocation13]   ;;  %s2034_s4 = smov [#allocation16]  }
  0x40   :  { %s110_s0 = sshll.u32 %s2033_s3, 4  ;;  %s134_s24 = sshll.u32 %s2034_s4, 4  ;;  %s111_s0 = int_to_ptr.vmem [resolvable:$true] %s110_s0  ;;  %s135_s24 = int_to_ptr.vmem [resolvable:$true] %s134_s24 }
  0x41   :  { %s1761_s27 = scalar_lea.hbm %s3024_s9, 16 }
  0x42   :  { %p1762_p2 = scmp.ne.s32.totalorder %s3024_s9, %s1761_s27  ;;  %p1765_p3 = scmp.lt.u32.totalorder %s1761_s27, %s3024_s9 }
  0x44   :  { %p1767_p4 = pnand %p1765_p3, %p1762_p2 }
  0x46   :  { %1770 = shalt.err (!%p1767_p4)
}
  0x47   :  { %s1771_s25 = scalar_lea.vmem %s111_s0, 16  ;;  %s1775_s5 = scalar_lea.vmem %s111_s0, 32 }
  0x48   :  { %p1772_p5 = scmp.ne.s32.totalorder %s111_s0, %s1771_s25  ;;  %p1776_p6 = scmp.lt.s32.totalorder %s111_s0, %s111_s0 }
  0x49   :  { %p1777_p7 = scmp.lt.s32.totalorder %s1775_s5, %s1771_s25 }
  0x4b   :  { %p1778_p8 = por %p1777_p7, %p1776_p6 }
  0x4d   :  { %p1779_p9 = pnand %p1778_p8, %p1772_p5 }
  0x4f   :  { %1782 = shalt.err (!%p1779_p9)
}
  0x50   :  { %113 = dma.hbm_to_vmem [thread:$0]  %s3024_s9, 16, %s111_s0, [#allocation14]  }
  0x51   :  { %s1783_s1 = scalar_lea.hbm %s3028_s13, 16 }
  0x52   :  { %p1784_p10 = scmp.ne.s32.totalorder %s3028_s13, %s1783_s1  ;;  %p1787_p11 = scmp.lt.u32.totalorder %s1783_s1, %s3028_s13 }
  0x54   :  { %p1789_p12 = pnand %p1787_p11, %p1784_p10 }
  0x56   :  { %1792 = shalt.err (!%p1789_p12)
}
  0x57   :  { %s1793_s28 = scalar_lea.vmem %s135_s24, 16  ;;  %s1797_s29 = scalar_lea.vmem %s135_s24, 32 }
  0x58   :  { %p1794_p13 = scmp.ne.s32.totalorder %s135_s24, %s1793_s28  ;;  %p1798_p0 = scmp.lt.s32.totalorder %s135_s24, %s135_s24 }
  0x59   :  { %p1799_p1 = scmp.lt.s32.totalorder %s1797_s29, %s1793_s28 }
  0x5b   :  { %p1800_p2 = por %p1799_p1, %p1798_p0 }
  0x5d   :  { %p1801_p3 = pnand %p1800_p2, %p1794_p13 }
  0x5f   :  { %1804 = shalt.err (!%p1801_p3)
}
  0x60   :  { %137 = dma.hbm_to_vmem [thread:$0]  %s3028_s13, 16, %s135_s24, [#allocation17]  }
  0x61   :  { %s3057_s30 = sld [smem:[#allocation39_spill]] }
  0x67   :  { %s1805_s26 = scalar_lea.hbm %s3057_s30, 16 }
  0x68   :  { %p1806_p4 = scmp.ne.s32.totalorder %s3057_s30, %s1805_s26  ;;  %p1809_p5 = scmp.lt.u32.totalorder %s1805_s26, %s3057_s30 }
  0x6a   :  { %p1811_p6 = pnand %p1809_p5, %p1806_p4 }
  0x6c   :  { %1814 = shalt.err (!%p1811_p6)
}
  0x6d   :  { %s2035_s27 = smov [#allocation2]   ;;  %s2036_s13 = smov [#allocation6]  }
  0x6e   :  { %45 = dma.hbm_to_smem %s3057_s30, 16, %s2035_s27, [#allocation5]  }
  0x6f   :  { %s53_s24 = sshll.u32 %s2036_s13, 4  ;;  %s3058_s9 = sld [smem:[#allocation41_spill]]  ;;  %s54_s24 = int_to_ptr.vmem [resolvable:$true] %s53_s24 }
  0x75   :  { %s1815_s0 = scalar_lea.hbm %s3058_s9, 256 }
  0x76   :  { %p1816_p7 = scmp.ne.s32.totalorder %s3058_s9, %s1815_s0  ;;  %p1819_p8 = scmp.lt.u32.totalorder %s1815_s0, %s3058_s9 }
  0x78   :  { %p1821_p9 = pnand %p1819_p8, %p1816_p7 }
  0x7a   :  { %1824 = shalt.err (!%p1821_p9)
}
  0x7b   :  { %s1825_s4 = scalar_lea.vmem %s54_s24, 256  ;;  %p1830_p11 = scmp.lt.s32.totalorder %s54_s24, %s54_s24 }
  0x7c   :  { %p1826_p10 = scmp.ne.s32.totalorder %s54_s24, %s1825_s4  ;;  %p1831_p12 = scmp.lt.s32.totalorder %s1825_s4, %s1825_s4 }
  0x7e   :  { %p1832_p13 = por %p1831_p12, %p1830_p11 }
  0x80   :  { %p1833_p0 = pnand %p1832_p13, %p1826_p10 }
  0x82   :  { %1836 = shalt.err (!%p1833_p0)
}
  0x83   :  { %s2037_s30 = smov 128   ;;  %s2038_s1 = smov 8  }
  0x84   :  { %59 = dma.hbm_to_vmem [thread:$0]  %s3058_s9, 256, %s54_s24, [#allocation3], %s2037_s30, %s2037_s30, %s2038_s1  }
  0x85   :  { %s2039_s2 = smov [#allocation9]   ;;  %s2040_s13 = smov [#allocation12]  }
  0x86   :  { %s80_s7 = sshll.u32 %s2039_s2, 4  ;;  %s100_s28 = sshll.u32 %s2040_s13, 4  ;;  %s81_s7 = int_to_ptr.vmem [resolvable:$true] %s80_s7  ;;  %s101_s28 = int_to_ptr.vmem [resolvable:$true] %s100_s28 }
  0x87   :  { %s3059_s25 = sld [smem:[#allocation45_spill]] }
  0x8d   :  { %s1837_s5 = scalar_lea.hbm %s3059_s25, 16 }
  0x8e   :  { %p1838_p1 = scmp.ne.s32.totalorder %s3059_s25, %s1837_s5  ;;  %p1841_p2 = scmp.lt.u32.totalorder %s1837_s5, %s3059_s25 }
  0x90   :  { %p1843_p3 = pnand %p1841_p2, %p1838_p1 }
  0x92   :  { %1846 = shalt.err (!%p1843_p3)
}
  0x93   :  { %s1847_s24 = scalar_lea.vmem %s81_s7, 16  ;;  %s1851_s9 = scalar_lea.vmem %s81_s7, 32 }
  0x94   :  { %p1848_p4 = scmp.ne.s32.totalorder %s81_s7, %s1847_s24  ;;  %p1852_p5 = scmp.lt.s32.totalorder %s81_s7, %s81_s7 }
  0x95   :  { %p1853_p6 = scmp.lt.s32.totalorder %s1851_s9, %s1847_s24 }
  0x97   :  { %p1854_p7 = por %p1853_p6, %p1852_p5 }
  0x99   :  { %p1855_p8 = pnand %p1854_p7, %p1848_p4 }
  0x9b   :  { %1858 = shalt.err (!%p1855_p8)
}
  0x9c   :  { %83 = dma.hbm_to_vmem [thread:$0]  %s3059_s25, 16, %s81_s7, [#allocation8]  }
  0x9d   :  { %s1859_s2 = scalar_lea.hbm %s3023_s8, 16 }
  0x9e   :  { %p1860_p9 = scmp.ne.s32.totalorder %s3023_s8, %s1859_s2  ;;  %p1863_p10 = scmp.lt.u32.totalorder %s1859_s2, %s3023_s8 }
  0xa0   :  { %p1865_p11 = pnand %p1863_p10, %p1860_p9 }
  0xa2   :  { %1868 = shalt.err (!%p1865_p11)
}
  0xa3   :  { %s1869_s5 = scalar_lea.vmem %s101_s28, 16  ;;  %s1873_s3 = scalar_lea.vmem %s101_s28, 32 }
  0xa4   :  { %p1870_p12 = scmp.ne.s32.totalorder %s101_s28, %s1869_s5  ;;  %p1874_p13 = scmp.lt.s32.totalorder %s101_s28, %s101_s28 }
  0xa5   :  { %p1875_p0 = scmp.lt.s32.totalorder %s1873_s3, %s1869_s5 }
  0xa7   :  { %p1876_p1 = por %p1875_p0, %p1874_p13 }
  0xa9   :  { %p1877_p2 = pnand %p1876_p1, %p1870_p12 }
  0xab   :  { %1880 = shalt.err (!%p1877_p2)
}
  0xac   :  { %103 = dma.hbm_to_vmem [thread:$0]  %s3023_s8, 16, %s101_s28, [#allocation11]  }
  0xad   :  { %s2041_s26 = smov [#allocation15]   ;;  %s2042_s24 = smov [#allocation18]  }
  0xae   :  { %s120_s4 = sshll.u32 %s2041_s26, 4  ;;  %s146_s9 = sshll.u32 %s2042_s24, 4  ;;  %s121_s4 = int_to_ptr.vmem [resolvable:$true] %s120_s4  ;;  %s147_s9 = int_to_ptr.vmem [resolvable:$true] %s146_s9 }
  0xaf   :  { %s1881_s6 = scalar_lea.hbm %s3025_s10, 16 }
  0xb0   :  { %p1882_p3 = scmp.ne.s32.totalorder %s3025_s10, %s1881_s6  ;;  %p1885_p4 = scmp.lt.u32.totalorder %s1881_s6, %s3025_s10 }
  0xb2   :  { %p1887_p5 = pnand %p1885_p4, %p1882_p3 }
  0xb4   :  { %1890 = shalt.err (!%p1887_p5)
}
  0xb5   :  { %s1891_s8 = scalar_lea.vmem %s121_s4, 16  ;;  %s1895_s28 = scalar_lea.vmem %s121_s4, 32 }
  0xb6   :  { %p1892_p6 = scmp.ne.s32.totalorder %s121_s4, %s1891_s8  ;;  %p1896_p7 = scmp.lt.s32.totalorder %s121_s4, %s121_s4 }
  0xb7   :  { %p1897_p8 = scmp.lt.s32.totalorder %s1895_s28, %s1891_s8 }
  0xb9   :  { %p1898_p9 = por %p1897_p8, %p1896_p7 }
  0xbb   :  { %p1899_p10 = pnand %p1898_p9, %p1892_p6 }
  0xbd   :  { %1902 = shalt.err (!%p1899_p10)
}
  0xbe   :  { %123 = dma.hbm_to_vmem [thread:$0]  %s3025_s10, 16, %s121_s4, [#allocation14]  }
  0xbf   :  { %s1903_s7 = scalar_lea.hbm %s3030_s15, 144 }
  0xc0   :  { %p1904_p11 = scmp.ne.s32.totalorder %s3030_s15, %s1903_s7  ;;  %p1907_p12 = scmp.lt.u32.totalorder %s1903_s7, %s3030_s15 }
  0xc2   :  { %p1909_p13 = pnand %p1907_p12, %p1904_p11 }
  0xc4   :  { %1912 = shalt.err (!%p1909_p13)
}
  0xc5   :  { %s1913_s1 = scalar_lea.vmem %s147_s9, 144  ;;  %s1917_s6 = scalar_lea.vmem %s147_s9, 160 }
  0xc6   :  { %p1914_p0 = scmp.ne.s32.totalorder %s147_s9, %s1913_s1  ;;  %p1918_p1 = scmp.lt.s32.totalorder %s147_s9, %s147_s9 }
  0xc7   :  { %p1919_p2 = scmp.lt.s32.totalorder %s1917_s6, %s1913_s1 }
  0xc9   :  { %p1920_p3 = por %p1919_p2, %p1918_p1 }
  0xcb   :  { %p1921_p4 = pnand %p1920_p3, %p1914_p0 }
  0xcd   :  { %1924 = shalt.err (!%p1921_p4)
}
  0xce   :  { %149 = dma.hbm_to_vmem [thread:$0]  %s3030_s15, 144, %s147_s9, [#allocation17]  }
  0xcf   :  { %2013 = dma.done.wait [#allocation5], 16  }
  0xd0   :  { %2014 = vsyncadd [#allocation5], 4294967280 }
  0xd1   :  { %2015 = dma.done.wait [#allocation3], 256  }
  0xd2   :  { %2016 = vsyncadd [#allocation3], 4294967040 }
  0xd3   :  { %2017 = dma.done.wait [#allocation8], 48  }
  0xd4   :  { %2018 = vsyncadd [#allocation8], 4294967248 }
  0xd5   :  { %2019 = dma.done.wait [#allocation11], 32  }
  0xd6   :  { %2020 = vsyncadd [#allocation11], 4294967264 }
  0xd7   :  { %2021 = dma.done.wait [#allocation14], 32  }
  0xd8   :  { %2022 = vsyncadd [#allocation14], 4294967264 }
  0xd9   :  { %2023 = dma.done.wait [#allocation17], 160  }
  0xda   :  { %2024 = vsyncadd [#allocation17], 4294967136 }
  0xdb   :  { %186 = sfence }
  0xdc   :  { %s3060_s19 = sld [smem:[#allocation44_spill]]  ;;  %v2043_v1 = vmov 0.0   ;;  %vm2044_vm0 = vmmov 0   ;;  %s3061_s0 = sld [smem:[#allocation40_spill]]  ;;  %vm221_vm1 = vcmask 392192   ;;  %v333_v20 = vlaneseq  ;;  %v2350_v43 = vld [vmem:[#allocation6] sm:$0xff] }
  0xdd   :  { %1579 = vmatprep.subr.bf16.mxu0 %v2043_v1  ;;  %1589 = vmatprep.subr.bf16.mxu1 %v2043_v1  ;;  %v1529_v6 = vld [vmem:[#allocation9] ss:$0 sm:$0xff]  ;;  %s2045_s5 = smov 32   ;;  %s2046_s3 = smov 64   ;;  %v1535_v21 = vld [vmem:[#allocation13] ss:$0 sm:$0xff] }
  0xde   :  { %1585 = vmatprep.mubr.msk.bf16.mxu0 %vm2044_vm0, %v2043_v1  ;;  %1593 = vmatprep.mubr.msk.bf16.mxu1 %vm2044_vm0, %v2043_v1  ;;  %s3062_s26 = sld [smem:[#allocation42_spill]]  ;;  %v2332_v23 = vshrl.u32 %v333_v20, 7  ;;  %s2047_s24 = smov 96   ;;  %v2049_v36 = vmov 1966171168   ;;  %vm298_vm2 = vcmask 254976  }
  0xdf   :  { %s2048_s30 = smov 16   ;;  %v331_v37 = vunpack.c.l.s4 %v2049_v36  ;;  %v1537_v39 = vld [vmem:[#allocation12] ss:$0 sm:$0xff]  ;;  %s302_s1 = sld [smem:[#allocation2]]  ;;  %v1536_v44 = vld [vmem:[#allocation10] ss:$0 sm:$0xff] }
  0xe0   :  { %v2336_v26 = vsub.s32 0, %v2332_v23  ;;  %v2341_v33 = vsub.s32 1, %v2332_v23  ;;  %v2352_v46 = vld [vmem:[#allocation6 + $0x8] sm:$0xff]  ;;  %v319_v49 = vmul.f32 %v1536_v44, %v2350_v43  ;;  %v1538_v63 = vld [vmem:[#allocation15] ss:$0 sm:$0xff]  ;;  %vm394_vm3 = vcmask 261120  }
  0xe1   :  { %v332_v38 = vunpack.c.0.s8 %v331_v37  ;;  %v320_v51 = vmul.f32 %v1536_v44, %v2352_v46  ;;  %vm413_vm4 = vcmask 1041409   ;;  %vm416_vm5 = vcmask 58368   ;;  %v1562_v44 = vld [vmem:[%s3031_s16] ss:$0 sm:$0xff]  ;;  %s1561_s15 = sld [smem:[#allocation2 + $0x1]] }
  0xe2   :  { %v1657_v0 = vld [vmem:[%s3060_s19] sm:$0xff]   ;;  %v1658_v2 = vld [vmem:[%s3060_s19 + $0x8] sm:$0xff]   ;;  %v1659_v3 = vld [vmem:[%s3060_s19 + $0x10] sm:$0xff]   ;;  %vm1082_vm6 = vcmask 123904   ;;  %vm753_vm7 = vcmask 130048   ;;  %vm1095_vm8 = vcmask 1024  }
  0xe3   :  { %1580 = vmatpush3.bf16.msra.mxu0 %v1657_v0  ;;  %v2322_v4 = vld [vmem:[%s3061_s0] sm:$0x3]  ;;  %v335_v40 = vsub.s32 %v332_v38, %v2332_v23  ;;  %vm961_vm9 = vcmask 1041408  }
  0xe4   :  { %1581 = vmatprep.subr.bf16.mxu0 %v2043_v1  ;;  %v189_v5 = vpack.c.bf16 %v2322_v4, %v2322_v4  ;;  %v304_v22 = vld [vmem:[%s3062_s26] sm:$0x3] }
  0xe5   :  { %v311_v25 = vmul.f32 %v1535_v21, %v304_v22  ;;  %v380_v56 = vstv %s302_s1 }
  0xe7   :  { %1582 = vmatpush3.bf16.msra.mxu0 %v1658_v2  ;;  %v367_v27 = vrot.slane %v311_v25, %v2336_v26  ;;  %v374_v35 = vrot.slane %v311_v25, %v2341_v33 }
  0xe8   :  { %1583 = vmatprep.subr.bf16.mxu0 %v2043_v1 }
  0xeb   :  { %1584 = vmatpush3.bf16.msra.mxu0 %v1659_v3 }
  0xee   :  { %1586 = vmatmul.mubr.msk.bf16.vlgmr.msra.gmra.mrb[0].mxu0 %vm221_vm1, %v189_v5 }
 0x1c1   :  { %v259_v7 = vpop.f32.mrb[0].mxu0 }
 0x1c2   :  { %v260_v8 = vadd.f32 %v1529_v6, %v259_v7  ;;  %v1587_v9 = vpop.f32.mrb[1].mxu0 }
 0x1c3   :  { %v262_v10 = vpop.f32.mrb[2].mxu0 }
 0x1c4   :  { %272 = vrot.lane.b32.xlu0 %v260_v8, %s2045_s5  ;;  %v1588_v11 = vpop.f32.mrb[3].mxu0  ;;  %v1534_v12 = vmul.f32 -1.442695, %v260_v8 }
 0x1c6   :  { %1677 = vpow2.f32 %v1534_v12 }
 0x1d0   :  { %v1678_v13 = vpop.eup %1677 }
 0x1d1   :  { %v268_v14 = vadd.f32 1.0, %v1678_v13 }
 0x1d3   :  { %1679 = vrcp.f32 %v268_v14 }
 0x1dd   :  { %v1680_v15 = vpop.eup %1679 }
 0x1de   :  { %v282_v29 = vsub.f32 1.0, %v1680_v15 }
 0x236   :  { %v273_v16 = vpop.permute.xlu0 %272 }
 0x237   :  { %v275_v17 = vmul.f32 %v1680_v15, %v273_v16  ;;  %v2050_v16 = vmov 0  }
 0x238   :  { %1644 = vset.pattern.permute.xlu0 %v2050_v16  ;;  %1643 = vset.pattern.permute.xlu1 %v2050_v16 }
 0x239   :  { %277 = vrot.lane.b32.xlu0 %v275_v17, %s2046_s3  ;;  %789 = vmatprep.mubr.bf16.mxu0 %v2050_v16 }
 0x2ab   :  { %v278_v18 = vpop.permute.xlu0 %277 }
 0x2ac   :  { %v280_v19 = vadd.f32 %v278_v18, %v260_v8  ;;  %v2361_v8 = vand.u32 127, %v333_v20 }
 0x2ae   :  { %1681 = vtanh.f32 %v280_v19  ;;  %v2365_v9 = vsub.s32 %v2361_v8, %v2332_v23 }
 0x2b8   :  { %v1682_v24 = vpop.eup %1681 }
 0x2b9   :  { %284 = vrot.lane.b32.xlu1 %v1682_v24, %s2047_s24 }
 0x2bd   :  { %289 = vrot.lane.b32.xlu1 %v2322_v4, %s2048_s30 }
 0x2c1   :  { %369 = vbcast.lane.b32.xlu1 %v367_v27, 256 }
 0x32b   :  { %v285_v28 = vpop.permute.xlu1 %284 }
 0x32c   :  { %v287_v31 = vmul.f32 %v285_v28, %v282_v29 }
 0x32f   :  { %v290_v30 = vpop.permute.xlu1 %289 }
 0x330   :  { %v292_v32 = vmul.f32 %v1680_v15, %v290_v30 }
 0x332   :  { %v2343_v34 = vadd.f32 %v292_v32, %v287_v31 }
 0x333   :  { %v370_v53 = vpop.permute.xlu1 %369 }
 0x334   :  { %295 = vrot.lane.b32.xlu0 %v2343_v34, %s2047_s24  ;;  %v509_v36 = vpack.c.bf16 %v2343_v34, %v2343_v34 }
 0x338   :  { %376 = vbcast.lane.b32.xlu0 %v374_v35, 256 }
 0x3a6   :  { %v296_v41 = vpop.permute.xlu0 %295 }
 0x3a7   :  { %v328_v42 = vmul.f32 %v1537_v39, %v296_v41  ;;  %299 = vst.msk [vmem:[#allocation23] sm:$0x3] %vm298_vm2, %v296_v41 }
 0x3a9   :  { %v336_v45 = vrot.slane %v328_v42, %v335_v40 }
 0x3aa   :  { %v377_v57 = vpop.permute.xlu0 %376 }
 0x3ab   :  { %v337_v47 = vcombine.high %v336_v45, %v336_v45  ;;  %v344_v48 = vrot.slane %v336_v45, %v335_v40  ;;  %v1660_v45 = vld [vmem:[%s3027_s12] sm:$0xff]  }
 0x3ac   :  { %1590 = vmatpush3.bf16.msra.mxu1 %v1660_v45  ;;  %v2056_v45 = vmov 6  }
 0x3ad   :  { %v355_v50 = vrot.slane %v344_v48, %v2336_v26  ;;  %v351_v52 = vrot.slane %v337_v47, %v335_v40  ;;  %1591 = vmatprep.subr.bf16.mxu1 %v2043_v1  ;;  %v1661_v47 = vld [vmem:[%s3027_s12 + $0x8] sm:$0xff]   ;;  %v1564_v48 = vld [vmem:[%s3033_s18] ss:$0 sm:$0xff] }
 0x3af   :  { %v362_v54 = vadd.f32 %v355_v50, %v319_v49  ;;  %v359_v55 = vrot.slane %v351_v52, %v2336_v26  ;;  %v1081_v49 = vmul.f32 %v1564_v48, %v2322_v4 }
 0x3b0   :  { %1592 = vmatpush3.bf16.msra.mxu1 %v1661_v47  ;;  %v2057_v47 = vmov 7  }
 0x3b1   :  { %v378_v58 = vadd.f32 %v370_v53, %v362_v54  ;;  %v363_v59 = vadd.f32 %v359_v55, %v320_v51  ;;  %1597 = vmatprep.subr.bf16.mxu1 %v2043_v1  ;;  %v1083_v50 = vsel %vm1082_vm6, %v1081_v49, 0.0  ;;  %v2401_v51 = vld [vmem:[#allocation7] sm:$0x3]  ;;  %v2051_v53 = vmov 1  }
 0x3b3   :  { %v381_v60 = vadd.f32 %v380_v56, %v378_v58  ;;  %v379_v61 = vadd.f32 %v377_v57, %v363_v59 }
 0x3b5   :  { %1683 = vtanh.f32 %v381_v60  ;;  %v382_v62 = vadd.f32 %v380_v56, %v379_v61 }
 0x3b7   :  { %1685 = vtanh.f32 %v382_v62 }
 0x3bf   :  { %v1684_v0 = vpop.eup %1683 }
 0x3c0   :  { %v392_v2 = vmul.f32 %v1684_v0, %v1538_v63 }
 0x3c1   :  { %v1686_v3 = vpop.eup %1685 }
 0x3c2   :  { %v395_v5 = vsel %vm394_vm3, %v392_v2, 0.0  ;;  %v393_v6 = vmul.f32 %v1686_v3, %v1538_v63 }
 0x3c3   :  { %396 = vadd.xlane.f32.xlu1 %v395_v5 }
 0x3c4   :  { %v398_v7 = vsel %vm394_vm3, %v393_v6, 0.0 }
 0x3c5   :  { %399 = vadd.xlane.f32.xlu0 %v398_v7 }
 0x450   :  { %v397_v10 = vpop.xlane.xlu1 %396 }
 0x451   :  { %v408_v12 = vrot.slane %v397_v10, %v2365_v9 }
 0x452   :  { %v400_v11 = vpop.xlane.xlu0 %399 }
 0x453   :  { %v412_v13 = vrot.slane %v400_v11, %v2365_v9 }
 0x455   :  { %v414_v14 = vsel %vm413_vm4, %v412_v13, %v408_v12 }
 0x456   :  { %v417_v15 = vsel %vm416_vm5, %v414_v14, -inf }
 0x457   :  { %418 = vmax.xlane.f32.xlu0 %v417_v15  ;;  %v2052_v15 = vmov 2  }
 0x4e4   :  { %v419_v17 = vpop.xlane.xlu0 %418 }
 0x4e5   :  { %v424_v18 = vrot.slane %v419_v17, %v2336_v26  ;;  %v428_v19 = vrot.slane %v419_v17, %v2341_v33 }
 0x4e7   :  { %v431_v20 = vsub.f32 %v397_v10, %v424_v18  ;;  %v432_v21 = vsub.f32 %v400_v11, %v428_v19  ;;  %v1662_v19 = vld [vmem:[%s3026_s11] sm:$0xff]  }
 0x4e9   :  { %v433_v22 = vmul.f32 1.442695, %v431_v20  ;;  %v435_v24 = vmul.f32 1.442695, %v432_v21  ;;  %v1663_v21 = vld [vmem:[%s3026_s11 + $0x8] sm:$0xff]  }
 0x4eb   :  { %1687 = vpow2.f32 %v433_v22 }
 0x4ec   :  { %1689 = vpow2.f32 %v435_v24  ;;  %v1563_v24 = vld [vmem:[%s3032_s17] ss:$0 sm:$0xff] }
 0x4f5   :  { %v1688_v25 = vpop.eup %1687 }
 0x4f6   :  { %v1690_v27 = vpop.eup %1689  ;;  %440 = vperm.xlu1 %1643, %v1688_v25  }
 0x4f7   :  { %443 = vperm.xlu0 %1644, %v1690_v27  }
 0x4fa   :  { %1645 = vset.pattern.permute.xlu1 %v2051_v53 }
 0x575   :  { %v441_v28 = vpop.permute.xlu1 %440 }
 0x576   :  { %v444_v29 = vpop.permute.xlu0 %443  ;;  %v448_v30 = vrot.slane %v441_v28, %v2365_v9 }
 0x577   :  { %v452_v31 = vrot.slane %v444_v29, %v2365_v9 }
 0x579   :  { %v453_v32 = vsel %vm413_vm4, %v452_v31, %v448_v30  ;;  %v1664_v31 = vld [vmem:[%s3029_s14] ss:$36 sps:$4 sm:$0xff]  }
 0x57a   :  { %v455_v35 = vsel %vm416_vm5, %v453_v32, 0.0  ;;  %v1666_v32 = vld [vmem:[%s3029_s14 + $0x4] ss:$36 sps:$4 sm:$0xff]  }
 0x57b   :  { %456 = vadd.xlane.f32.xlu1 %v455_v35  ;;  %757 = vmatprep.subr.bf16.mxu0 %v1666_v32  ;;  %v1669_v35 = vld [vmem:[%s3029_s14 + $0xc] ss:$36 sps:$4 sm:$0xff]  }
 0x57c   :  { %758 = vmatpush1.bf16.msra.mxu0 %v1664_v31 }
 0x58c   :  { %582 = vrot.lane.b32.xlu1 %v509_v36, %s2047_s24  ;;  %v1667_v36 = vld [vmem:[%s3029_s14 + $0x8] ss:$36 sps:$4 sm:$0xff]  }
 0x608   :  { %v457_v37 = vpop.xlane.xlu1 %456 }
 0x609   :  { %1691 = vrcp.f32 %v457_v37  ;;  %v1672_v37 = vld [vmem:[%s3029_s14 + $0x14] ss:$36 sps:$4 sm:$0xff]  }
 0x60a   :  { %839 = vmatprep.subr.bf16.mxu0 %v1672_v37 }
 0x60c   :  { %v583_v22 = vpop.permute.xlu1 %582 }
 0x613   :  { %v1692_v38 = vpop.eup %1691 }
 0x614   :  { %v463_v39 = vrot.slane %v1692_v38, %v2336_v26  ;;  %v467_v41 = vrot.slane %v1692_v38, %v2341_v33 }
 0x616   :  { %v470_v40 = vmul.f32 %v1688_v25, %v463_v39  ;;  %v471_v42 = vmul.f32 %v1690_v27, %v467_v41  ;;  %v2053_v41 = vmov 3  }
 0x618   :  { %475 = vperm.xlu0 %1644, %v470_v40   ;;  %v1675_v40 = vld [vmem:[%s3029_s14 + $0x1c] ss:$36 sps:$4 sm:$0xff]  }
 0x61c   :  { %478 = vperm.xlu0 %1644, %v471_v42   ;;  %v2054_v42 = vmov 4  }
 0x620   :  { %1045 = vrot.lane.b32.xlu0 %v1562_v44, %s2045_s5  ;;  %v2055_v44 = vmov 5  }
 0x63f   :  { %1084 = vadd.xlane.f32.xlu0 %v1083_v50 }
 0x655   :  { %1108 = vperm.xlu0 %1644, %v2401_v51  }
 0x697   :  { %v476_v52 = vpop.permute.xlu0 %475 }
 0x698   :  { %v493_v54 = vmul.f32 %v476_v52, %v2350_v43  ;;  %v483_v58 = vrot.slane %v476_v52, %v2365_v9 }
 0x69a   :  { %v495_v55 = vsel %vm394_vm3, %v493_v54, 0.0  ;;  %v1545_v54 = vld [vmem:[#allocation16] ss:$0 sm:$0xff] }
 0x69b   :  { %v496_v56 = vrot.slane %v495_v55, 4  ;;  %v479_v57 = vpop.permute.xlu0 %478 }
 0x69c   :  { %v487_v4 = vrot.slane %v479_v57, %v2365_v9  ;;  %v494_v59 = vmul.f32 %v479_v57, %v2352_v46 }
 0x69d   :  { %v497_v60 = vadd.f32 %v496_v56, %v495_v55 }
 0x69e   :  { %v488_v61 = vsel %vm413_vm4, %v487_v4, %v483_v58  ;;  %v502_v62 = vsel %vm394_vm3, %v494_v59, 0.0  ;;  %v1670_v59 = vld [vmem:[%s3029_s14 + $0x10] ss:$36 sps:$4 sm:$0xff]  }
 0x69f   :  { %v498_v63 = vrot.slane %v497_v60, 2  ;;  %490 = vst.msk [vmem:[#allocation22] sm:$0x3] %vm416_vm5, %v488_v61  ;;  %v503_v0 = vrot.slane %v502_v62, 4  ;;  %v1046_v43 = vpop.permute.xlu0 %1045 }
 0x6a0   :  { %v1048_v2 = vmul.f32 %v1046_v43, %v2343_v34 }
 0x6a1   :  { %v499_v3 = vadd.f32 %v498_v63, %v497_v60  ;;  %v504_v5 = vadd.f32 %v503_v0, %v502_v62  ;;  %v1673_v60 = vld [vmem:[%s3029_s14 + $0x18] ss:$36 sps:$4 sm:$0xff]   ;;  %v1676_v63 = vld [vmem:[%s3029_s14 + $0x20] ss:$36 sps:$4 sm:$0xff]  }
 0x6a2   :  { %1050 = vrot.lane.b32.xlu1 %v1048_v2, %s2047_s24 }
 0x6a3   :  { %v500_v6 = vrot.slane %v499_v3, 1  ;;  %v505_v7 = vrot.slane %v504_v5, 2 }
 0x6a5   :  { %v501_v9 = vadd.f32 %v500_v6, %v499_v3  ;;  %v506_v46 = vadd.f32 %v505_v7, %v504_v5  ;;  %v1087_v5 = vstv %s1561_s15 }
 0x6a6   :  { %v2414_v10 = vld [vmem:[#allocation22] sm:$0x3] }
 0x6a7   :  { %v507_v11 = vrot.slane %v506_v46, 1  ;;  %1121 = vperm.xlu0 %1644, %v2414_v10   ;;  %v514_v12 = vpack.c.bf16 %v501_v9, %v501_v9  ;;  %v1063_v28 = vmul.f32 %v1563_v24, %v501_v9 }
 0x6a9   :  { %v508_v13 = vadd.f32 %v507_v11, %v506_v46  ;;  %v522_v17 = vunpack.c.l.b16 %v514_v12 }
 0x6ab   :  { %v515_v14 = vpack.c.bf16 %v508_v13, %v508_v13  ;;  %1646 = vset.pattern.permute.xlu0 %v2052_v15  ;;  %v1064_v25 = vmul.f32 %v1563_v24, %v508_v13  ;;  %v658_v24 = vld [vmem:[#allocation18] sm:$0xff] }
 0x6ac   :  { %v665_v32 = vrot.slane %v658_v24, %v2336_v26 }
 0x6ad   :  { %v523_v34 = vunpack.c.l.b16 %v515_v14  ;;  %v1067_v27 = vrot.slane %v1064_v25, 7  ;;  %v672_v25 = vsub.s32 2, %v2332_v23 }
 0x6af   :  { %v524_v18 = vsel %vm413_vm4, %v523_v34, %v522_v17  ;;  %v1068_v29 = vsel %vm413_vm4, %v1067_v27, %v1063_v28  ;;  %v676_v27 = vsub.s32 3, %v2332_v23  ;;  %v684_v28 = vsub.s32 5, %v2332_v23 }
 0x6b0   :  { %v525_v20 = vpack.c.b16 %v524_v18, %v524_v18  ;;  %v1070_v30 = vsel %vm298_vm2, %v1068_v29, 0.0  ;;  %v673_v37 = vrot.slane %v658_v24, %v672_v25 }
 0x6b2   :  { %1594 = vmatmul.mubr.msk.bf16.vlgmr.msra.gmra.mrb[0].mxu1 %vm394_vm3, %v525_v20  ;;  %v680_v20 = vsub.s32 4, %v2332_v23 }
 0x6b3   :  { %1598 = vmatpush3.bf16.msra.mxu1 %v1662_v19  ;;  %1601 = vmatprep.mubr.msk.bf16.mxu1 %vm2044_vm0, %v2043_v1 }
 0x6b4   :  { %1599 = vmatprep.subr.bf16.mxu1 %v2043_v1  ;;  %v681_v29 = vrot.slane %v658_v24, %v680_v20 }
 0x6b7   :  { %1600 = vmatpush3.bf16.msra.mxu1 %v1663_v21  ;;  %v688_v21 = vsub.s32 6, %v2332_v23 }
 0x6b8   :  { %798 = vmatprep.subr.bf16.mxu1 %v1669_v35 }
 0x6ba   :  { %1602 = vmatmul.mubr.msk.bf16.vlgmr.msra.gmra.mrb[4].mxu1 %vm394_vm3, %v583_v22  ;;  %v692_v22 = vsub.s32 7, %v2332_v23 }
 0x6bb   :  { %830 = vmatprep.mubr.bf16.mxu1 %v2050_v16  ;;  %799 = vmatpush1.bf16.msra.mxu1 %v1667_v36 }
 0x6bc   :  { %880 = vmatprep.subr.bf16.mxu1 %v1675_v40  ;;  %v693_v31 = vrot.slane %v658_v24, %v692_v22 }
 0x6c6   :  { %1071 = vadd.xlane.f32.xlu0 %v1070_v30  ;;  %v689_v30 = vrot.slane %v658_v24, %v688_v21 }
 0x6cc   :  { %v1085_v62 = vpop.xlane.xlu0 %1084 }
 0x6d4   :  { %v2482_v0 = vpop.permute.xlu0 %1108 }
 0x714   :  { %v1051_v38 = vpop.permute.xlu1 %1050 }
 0x715   :  { %v1053_v39 = vsel %vm298_vm2, %v1051_v38, 0.0  ;;  %v677_v38 = vrot.slane %v658_v24, %v676_v27 }
 0x716   :  { %1054 = vadd.xlane.f32.xlu1 %v1053_v39  ;;  %v685_v39 = vrot.slane %v658_v24, %v684_v28 }
 0x726   :  { %v2488_v43 = vpop.permute.xlu0 %1121 }
 0x727   :  { %1143 = vperm.xlu1 %1645, %v2401_v51  }
 0x72b   :  { %1155 = vperm.xlu1 %1645, %v2414_v10  }
 0x72f   :  { %1647 = vset.pattern.permute.xlu1 %v2052_v15 }
 0x730   :  { %1189 = vperm.xlu1 %1647, %v2414_v10  }
 0x734   :  { %1648 = vset.pattern.permute.xlu1 %v2053_v41 }
 0x735   :  { %1211 = vperm.xlu1 %1648, %v2401_v51  }
 0x739   :  { %1650 = vset.pattern.permute.xlu1 %v2054_v42 }
 0x73a   :  { %1245 = vperm.xlu1 %1650, %v2401_v51  }
 0x73e   :  { %1257 = vperm.xlu1 %1650, %v2414_v10  }
 0x742   :  { %1652 = vset.pattern.permute.xlu1 %v2055_v44 }
 0x743   :  { %1291 = vperm.xlu1 %1652, %v2414_v10  }
 0x747   :  { %1653 = vset.pattern.permute.xlu1 %v2056_v45 }
 0x748   :  { %1313 = vperm.xlu1 %1653, %v2401_v51  }
 0x74c   :  { %1655 = vset.pattern.permute.xlu1 %v2057_v47 }
 0x74d   :  { %1347 = vperm.xlu1 %1655, %v2401_v51  }
 0x751   :  { %1359 = vperm.xlu1 %1655, %v2414_v10  }
 0x785   :  { %v575_v48 = vpop.f32.mrb[0].mxu1 }
 0x786   :  { %v1595_v49 = vpop.f32.mrb[1].mxu1 }
 0x787   :  { %v578_v50 = vpop.f32.mrb[2].mxu1 }
 0x788   :  { %v1596_v52 = vpop.f32.mrb[3].mxu1  ;;  %v669_v50 = vrot.slane %v658_v24, %v2341_v33 }
 0x78d   :  { %v633_v53 = vpop.f32.mrb[4].mxu1 }
 0x78e   :  { %v634_v55 = vadd.f32 %v633_v53, %v575_v48  ;;  %v1603_v56 = vpop.f32.mrb[5].mxu1 }
 0x78f   :  { %v636_v57 = vpop.f32.mrb[6].mxu1 }
 0x790   :  { %v646_v58 = vadd.f32 %v1545_v54, %v634_v55  ;;  %v1604_v4 = vpop.f32.mrb[7].mxu1 }
 0x792   :  { %v647_v61 = vpack.c.bf16 %v646_v58, %v646_v58 }
 0x794   :  { %1556 = vmatmul.mubr.msk.bf16.vlgmr.msra.gmra.mrb[4].mxu0 %vm753_vm7, %v647_v61  ;;  %1557 = vmatmul.mubr.msk.bf16.vlgmr.msra.gmra.mrb[8].mxu1 %vm753_vm7, %v647_v61 }
 0x795   :  { %840 = vmatpush1.bf16.msra.mxu0 %v1670_v59  ;;  %881 = vmatpush1.bf16.msra.mxu1 %v1673_v60  ;;  %v1546_v59 = vld [vmem:[#allocation18 + $0x8] ss:$0 sm:$0xff] }
 0x796   :  { %871 = vmatprep.mubr.bf16.mxu0 %v2050_v16  ;;  %912 = vmatprep.mubr.bf16.mxu1 %v2050_v16  ;;  %v1072_v16 = vpop.xlane.xlu0 %1071 }
 0x797   :  { %1605 = vmatprep.subr.bf16.mxu0 %v2043_v1 }
 0x79c   :  { %1558 = vmatmul.mubr.msk.bf16.vlgmr.msra.gmra.mrb[8].mxu0 %vm753_vm7, %v647_v61  ;;  %1559 = vmatmul.mubr.msk.bf16.vlgmr.msra.gmra.mrb[12].mxu1 %vm753_vm7, %v647_v61 }
 0x79d   :  { %1606 = vmatpush3.bf16.msra.mxu0 %v1676_v63  ;;  %1607 = vmatprep.mubr.msk.bf16.mxu0 %vm2044_vm0, %v2043_v1 }
 0x7a3   :  { %v1055_v2 = vpop.xlane.xlu1 %1054 }
 0x7a4   :  { %v1073_v3 = vadd.f32 %v1072_v16, %v1055_v2  ;;  %1608 = vmatmul.mubr.msk.bf16.vlgmr.msra.gmra.mrb[12].mxu0 %vm753_vm7, %v647_v61 }
 0x7a6   :  { %v1086_v6 = vadd.f32 %v1085_v62, %v1073_v3 }
 0x7a8   :  { %v1088_v7 = vadd.f32 %v1087_v5, %v1086_v6 }
 0x7aa   :  { %v1565_v9 = vmul.f32 -1.442695, %v1088_v7 }
 0x7ac   :  { %1693 = vpow2.f32 %v1565_v9 }
 0x7b6   :  { %v1694_v46 = vpop.eup %1693 }
 0x7b7   :  { %v1092_v11 = vadd.f32 1.0, %v1694_v46 }
 0x7b9   :  { %1695 = vrcp.f32 %v1092_v11 }
 0x7c3   :  { %v2491_v12 = vpop.eup %1695 }
 0x7c4   :  { %1096 = vst.msk [vmem:[%s3037_s22] sm:$0x3] %vm1095_vm8, %v2491_v12  ;;  %s2058_s22 = smov [#allocation23]  }
 0x7c5   :  { %s1502_s12 = sshll.u32 %s2058_s22, 4  ;;  %s1503_s12 = int_to_ptr.vmem [resolvable:$true] %s1502_s12 }
 0x7c6   :  { %s1925_s16 = scalar_lea.vmem %s1503_s12, 32  ;;  %p1930_p6 = scmp.lt.s32.totalorder %s1503_s12, %s1503_s12 }
 0x7c7   :  { %p1926_p5 = scmp.ne.s32.totalorder %s1503_s12, %s1925_s16  ;;  %p1931_p7 = scmp.lt.s32.totalorder %s1925_s16, %s1925_s16 }
 0x7c9   :  { %p1932_p8 = por %p1931_p7, %p1930_p6 }
 0x7cb   :  { %p1933_p9 = pnand %p1932_p8, %p1926_p5 }
 0x867   :  { %v791_v1 = vpop.f32.mrb[4].mxu0  ;;  %v832_v13 = vpop.f32.mrb[8].mxu1 }
 0x868   :  { %v793_v14 = vpop.f32.mrb[5].mxu0  ;;  %v834_v15 = vpop.f32.mrb[9].mxu1  ;;  %v792_v57 = vadd.f32 %v791_v1, %v665_v32  ;;  %v833_v58 = vadd.f32 %v832_v13, %v673_v37 }
 0x869   :  { %v795_v17 = vpop.f32.mrb[6].mxu0  ;;  %v836_v34 = vpop.f32.mrb[10].mxu1  ;;  %v835_v26 = vadd.f32 %v834_v15, %v677_v38  ;;  %v794_v60 = vadd.f32 %v793_v14, %v669_v50 }
 0x86a   :  { %v796_v18 = vpop.f32.mrb[7].mxu0  ;;  %v837_v19 = vpop.f32.mrb[11].mxu1  ;;  %v962_v33 = vsel %vm961_vm9, %v792_v57, -inf  ;;  %v964_v2 = vsel %vm961_vm9, %v833_v58, -inf }
 0x86b   :  { %v965_v3 = vsel %vm961_vm9, %v835_v26, -inf  ;;  %v963_v13 = vsel %vm961_vm9, %v794_v60, -inf }
 0x86f   :  { %v873_v35 = vpop.f32.mrb[8].mxu0  ;;  %v914_v36 = vpop.f32.mrb[12].mxu1 }
 0x870   :  { %v875_v40 = vpop.f32.mrb[9].mxu0  ;;  %v916_v42 = vpop.f32.mrb[13].mxu1  ;;  %v874_v52 = vadd.f32 %v873_v35, %v681_v29  ;;  %v915_v53 = vadd.f32 %v914_v36, %v689_v30 }
 0x871   :  { %v877_v48 = vpop.f32.mrb[10].mxu0  ;;  %v918_v49 = vpop.f32.mrb[14].mxu1  ;;  %v917_v54 = vadd.f32 %v916_v42, %v693_v31  ;;  %v876_v4 = vadd.f32 %v875_v40, %v685_v39 }
 0x872   :  { %v878_v55 = vpop.f32.mrb[11].mxu0  ;;  %v919_v56 = vpop.f32.mrb[15].mxu1  ;;  %v966_v61 = vsel %vm961_vm9, %v874_v52, -inf  ;;  %v970_v62 = vsel %vm961_vm9, %v915_v53, -inf }
 0x873   :  { %v972_v63 = vsel %vm961_vm9, %v917_v54, -inf  ;;  %v968_v5 = vsel %vm961_vm9, %v876_v4, -inf  ;;  %v967_v9 = vmax.f32 %v962_v33, %v966_v61  ;;  %v971_v46 = vmax.f32 %v964_v2, %v970_v62 }
 0x874   :  { %v973_v11 = vmax.f32 %v965_v3, %v972_v63  ;;  %v969_v17 = vmax.f32 %v963_v13, %v968_v5 }
 0x876   :  { %v977_v19 = vmax.f32 %v971_v46, %v973_v11 }
 0x877   :  { %v955_v16 = vpop.f32.mrb[12].mxu0 }
 0x878   :  { %v956_v6 = vadd.f32 %v1546_v59, %v955_v16  ;;  %v1609_v7 = vpop.f32.mrb[13].mxu0 }
 0x879   :  { %v958_v1 = vpop.f32.mrb[14].mxu0 }
 0x87a   :  { %v974_v14 = vsel %vm961_vm9, %v956_v6, -inf  ;;  %v1610_v15 = vpop.f32.mrb[15].mxu0 }
 0x87b   :  { %v975_v34 = vmax.f32 %v967_v9, %v974_v14 }
 0x87d   :  { %v976_v18 = vmax.f32 %v975_v34, %v969_v17 }
 0x87f   :  { %v978_v20 = vmax.f32 %v976_v18, %v977_v19 }
 0x881   :  { %979 = vmax.xlane.f32.xlu0 %v978_v20 }
 0x897   :  { %1177 = vperm.xlu0 %1646, %v2401_v51  }
 0x89b   :  { %1649 = vset.pattern.permute.xlu0 %v2053_v41 }
 0x89c   :  { %1223 = vperm.xlu0 %1649, %v2414_v10  }
 0x8a0   :  { %1651 = vset.pattern.permute.xlu0 %v2055_v44 }
 0x8a1   :  { %1279 = vperm.xlu0 %1651, %v2401_v51  }
 0x8a5   :  { %1654 = vset.pattern.permute.xlu0 %v2056_v45 }
 0x90e   :  { %v980_v21 = vpop.xlane.xlu0 %979 }
 0x90f   :  { %v981_v22 = vsub.f32 %v792_v57, %v980_v21  ;;  %v982_v24 = vsub.f32 %v794_v60, %v980_v21  ;;  %v983_v25 = vsub.f32 %v833_v58, %v980_v21  ;;  %v984_v27 = vsub.f32 %v835_v26, %v980_v21 }
 0x910   :  { %v985_v28 = vsub.f32 %v874_v52, %v980_v21  ;;  %v986_v32 = vsub.f32 %v876_v4, %v980_v21  ;;  %v987_v41 = vsub.f32 %v915_v53, %v980_v21  ;;  %v988_v44 = vsub.f32 %v917_v54, %v980_v21 }
 0x911   :  { %v990_v29 = vmul.f32 1.442695, %v981_v22  ;;  %v992_v30 = vmul.f32 1.442695, %v982_v24  ;;  %v994_v31 = vmul.f32 1.442695, %v983_v25  ;;  %v989_v45 = vsub.f32 %v956_v6, %v980_v21 }
 0x912   :  { %v996_v35 = vmul.f32 1.442695, %v984_v27  ;;  %v998_v36 = vmul.f32 1.442695, %v985_v28  ;;  %v1000_v51 = vmul.f32 1.442695, %v986_v32 }
 0x913   :  { %1697 = vpow2.f32 %v990_v29  ;;  %v1002_v37 = vmul.f32 1.442695, %v987_v41  ;;  %v1004_v38 = vmul.f32 1.442695, %v988_v44  ;;  %v1006_v39 = vmul.f32 1.442695, %v989_v45 }
 0x914   :  { %1699 = vpow2.f32 %v992_v30 }
 0x915   :  { %1701 = vpow2.f32 %v994_v31 }
 0x916   :  { %1703 = vpow2.f32 %v996_v35 }
 0x917   :  { %1705 = vpow2.f32 %v998_v36 }
 0x918   :  { %1707 = vpow2.f32 %v1000_v51 }
 0x919   :  { %1709 = vpow2.f32 %v1002_v37 }
 0x91a   :  { %1711 = vpow2.f32 %v1004_v38 }
 0x91b   :  { %1713 = vpow2.f32 %v1006_v39 }
 0x91d   :  { %v2520_v40 = vpop.eup %1697 }
 0x91e   :  { %v2522_v42 = vpop.eup %1699  ;;  %v1008_v48 = vsel %vm961_vm9, %v2520_v40, 0.0 }
 0x91f   :  { %v2526_v49 = vpop.eup %1701  ;;  %v1009_v50 = vsel %vm961_vm9, %v2522_v42, 0.0 }
 0x920   :  { %v2530_v52 = vpop.eup %1703  ;;  %v1010_v53 = vadd.f32 %v1009_v50, %v1008_v48  ;;  %v1011_v54 = vsel %vm961_vm9, %v2526_v49, 0.0 }
 0x921   :  { %v2534_v55 = vpop.eup %1705  ;;  %v1013_v57 = vsel %vm961_vm9, %v2530_v52, 0.0 }
 0x922   :  { %v1012_v56 = vadd.f32 %v1011_v54, %v1010_v53  ;;  %v2538_v58 = vpop.eup %1707  ;;  %v1015_v4 = vsel %vm961_vm9, %v2534_v55, 0.0 }
 0x923   :  { %v2542_v59 = vpop.eup %1709  ;;  %v1017_v61 = vsel %vm961_vm9, %v2538_v58, 0.0 }
 0x924   :  { %v1014_v26 = vadd.f32 %v1013_v57, %v1012_v56  ;;  %v2546_v62 = vpop.eup %1711  ;;  %v1019_v33 = vsel %vm961_vm9, %v2542_v59, 0.0 }
 0x925   :  { %v2550_v16 = vpop.eup %1713  ;;  %v1021_v3 = vsel %vm961_vm9, %v2546_v62, 0.0 }
 0x926   :  { %v1016_v60 = vadd.f32 %v1015_v4, %v1014_v26  ;;  %v1023_v6 = vsel %vm961_vm9, %v2550_v16, 0.0 }
 0x928   :  { %v1018_v63 = vadd.f32 %v1017_v61, %v1016_v60 }
 0x92a   :  { %v1020_v2 = vadd.f32 %v1019_v33, %v1018_v63 }
 0x92c   :  { %v1022_v5 = vadd.f32 %v1021_v3, %v1020_v2 }
 0x92e   :  { %v1024_v7 = vadd.f32 %v1023_v6, %v1022_v5 }
 0x930   :  { %1025 = vadd.xlane.f32.xlu0 %v1024_v7 }
 0x946   :  { %1325 = vperm.xlu0 %1654, %v2414_v10  }
 0x94a   :  { %1656 = vset.pattern.permute.xlu0 %v2057_v47 }
 0x94b   :  { %1936 = shalt.err (!%p1933_p9)
}
 0x94c   :  { %s1937_s8 = scalar_lea.hbm %s3038_s23, 32 }
 0x94d   :  { %p1938_p10 = scmp.ne.s32.totalorder %s3038_s23, %s1937_s8  ;;  %p1941_p11 = scmp.lt.u32.totalorder %s1937_s8, %s3038_s23 }
 0x94f   :  { %p1943_p12 = pnand %p1941_p11, %p1938_p10 }
 0x951   :  { %1946 = shalt.err (!%p1943_p12)
}
 0x952   :  { %1505 = dma.vmem_to_hbm [thread:$0]  %s1503_s12, 32, %s3038_s23, [#allocation24]   ;;  %v1144_v10 = vpop.permute.xlu1 %1143  ;;  %v2579_v13 = vadd.s32 128, %v2361_v8  ;;  %v2582_v14 = vadd.s32 256, %v2361_v8  ;;  %v2585_v15 = vadd.s32 384, %v2361_v8  ;;  %v2588_v17 = vadd.s32 512, %v2361_v8 }
 0x953   :  { %v2591_v34 = vadd.s32 640, %v2361_v8  ;;  %v2594_v18 = vadd.s32 768, %v2361_v8  ;;  %v2597_v19 = vadd.s32 896, %v2361_v8  ;;  %v2600_v20 = vadd.s32 1024, %v2361_v8  ;;  %s2060_s23 = smov [#allocation20]   ;;  %s2061_s7 = smov [#allocation22]  }
 0x954   :  { %vm1111_vm10 = vcmp.eq.s32.totalorder %v2579_v13, %v2482_v0  ;;  %vm1112_vm11 = vcmp.eq.s32.totalorder %v2582_v14, %v2482_v0  ;;  %vm1113_vm12 = vcmp.eq.s32.totalorder %v2585_v15, %v2482_v0  ;;  %vm1114_vm13 = vcmp.eq.s32.totalorder %v2588_v17, %v2482_v0  ;;  %s1480_s3 = sshll.u32 %s2060_s23, 4  ;;  %s1490_s25 = sshll.u32 %s2061_s7, 4  ;;  %s1481_s3 = int_to_ptr.vmem [resolvable:$true] %s1480_s3  ;;  %s2940_s25 = int_to_ptr.vmem [resolvable:$true] %s1490_s25 }
 0x955   :  { %vm1115_vm14 = vcmp.eq.s32.totalorder %v2591_v34, %v2482_v0  ;;  %vm1116_vm15 = vcmp.eq.s32.totalorder %v2594_v18, %v2482_v0  ;;  %vm1117_vm0 = vcmp.eq.s32.totalorder %v2597_v19, %v2482_v0  ;;  %vm1110_vm1 = vcmp.eq.s32.totalorder %v2361_v8, %v2482_v0  ;;  %s1947_s26 = scalar_lea.vmem %s1481_s3, 32  ;;  %p1952_p0 = scmp.lt.s32.totalorder %s1481_s3, %s1481_s3 }
 0x956   :  { %v1156_v47 = vpop.permute.xlu1 %1155  ;;  %v1125_v22 = vsel %vm1111_vm10, %v2488_v43, 0.0  ;;  %vm1146_vm2 = vcmp.eq.s32.totalorder %v2579_v13, %v1144_v10  ;;  %vm1147_vm3 = vcmp.eq.s32.totalorder %v2582_v14, %v1144_v10  ;;  %vm1118_vm4 = vcmp.eq.s32.totalorder %v2600_v20, %v2482_v0  ;;  %v2672_v0 = vpop.permute.xlu0 %1177  ;;  %p1948_p13 = scmp.ne.s32.totalorder %s1481_s3, %s1947_s26  ;;  %p1953_p1 = scmp.lt.s32.totalorder %s1947_s26, %s1947_s26 }
 0x957   :  { %v1126_v24 = vsel %vm1112_vm11, %v2488_v43, 0.0  ;;  %v1127_v25 = vsel %vm1113_vm12, %v2488_v43, 0.0  ;;  %vm1148_vm5 = vcmp.eq.s32.totalorder %v2585_v15, %v1144_v10  ;;  %vm1149_vm6 = vcmp.eq.s32.totalorder %v2588_v17, %v1144_v10 }
 0x958   :  { %v1128_v28 = vsel %vm1114_vm13, %v2488_v43, 0.0  ;;  %v1129_v29 = vsel %vm1115_vm14, %v2488_v43, 0.0  ;;  %vm1150_vm7 = vcmp.eq.s32.totalorder %v2591_v34, %v1144_v10  ;;  %vm1151_vm8 = vcmp.eq.s32.totalorder %v2594_v18, %v1144_v10  ;;  %p1954_p2 = por %p1953_p1, %p1952_p0 }
 0x959   :  { %v1130_v30 = vsel %vm1116_vm15, %v2488_v43, 0.0  ;;  %vm1152_vm9 = vcmp.eq.s32.totalorder %v2597_v19, %v1144_v10  ;;  %v1159_v31 = vsel %vm1146_vm2, %v1156_v47, 0.0  ;;  %v1160_v32 = vsel %vm1147_vm3, %v1156_v47, 0.0 }
 0x95a   :  { %v2570_v9 = vpop.permute.xlu1 %1189  ;;  %v1161_v35 = vsel %vm1148_vm5, %v1156_v47, 0.0  ;;  %v1162_v41 = vsel %vm1149_vm6, %v1156_v47, 0.0  ;;  %vm1145_vm10 = vcmp.eq.s32.totalorder %v2361_v8, %v1144_v10  ;;  %vm1153_vm11 = vcmp.eq.s32.totalorder %v2600_v20, %v1144_v10  ;;  %p1955_p3 = pnand %p1954_p2, %p1948_p13 }
 0x95b   :  { %v1131_v36 = vsel %vm1117_vm0, %v2488_v43, 0.0  ;;  %v1163_v44 = vsel %vm1150_vm7, %v1156_v47, 0.0  ;;  %v1164_v51 = vsel %vm1151_vm8, %v1156_v47, 0.0  ;;  %v1124_v45 = vsel %vm1110_vm1, %v2488_v43, 0.0 }
 0x95c   :  { %v1165_v37 = vsel %vm1152_vm9, %v1156_v47, 0.0  ;;  %v2650_v38 = vadd.f32 %v1159_v31, %v1125_v22  ;;  %v2652_v39 = vadd.f32 %v1160_v32, %v1126_v24  ;;  %v1132_v48 = vsel %vm1118_vm4, %v2488_v43, 0.0 }
 0x95d   :  { %v2658_v50 = vadd.f32 %v1161_v35, %v1127_v25  ;;  %v2660_v53 = vadd.f32 %v1162_v41, %v1128_v28  ;;  %v1158_v56 = vsel %vm1145_vm10, %v1156_v47, 0.0  ;;  %v1166_v57 = vsel %vm1153_vm11, %v1156_v47, 0.0  ;;  %v1224_v47 = vpop.permute.xlu0 %1223 }
 0x95e   :  { %v2572_v46 = vpop.permute.xlu1 %1211  ;;  %v2664_v26 = vadd.f32 %v1163_v44, %v1129_v29  ;;  %v2666_v4 = vadd.f32 %v1164_v51, %v1130_v30  ;;  %v2682_v43 = vadd.f32 %v1165_v37, %v1131_v36  ;;  %v1167_v60 = vadd.f32 %v1158_v56, %v1124_v45 }
 0x95f   :  { %v2684_v61 = vadd.f32 %v1166_v57, %v1132_v48  ;;  %v2732_v22 = vsub.f32 1.0, %v2491_v12 }
 0x961   :  { %v2803_v36 = vpop.permute.xlu0 %1279 }
 0x962   :  { %v2574_v11 = vpop.permute.xlu1 %1245 }
 0x963   :  { %vm1247_vm12 = vcmp.eq.s32.totalorder %v2361_v8, %v2574_v11  ;;  %vm1248_vm13 = vcmp.eq.s32.totalorder %v2579_v13, %v2574_v11  ;;  %vm1249_vm14 = vcmp.eq.s32.totalorder %v2582_v14, %v2574_v11  ;;  %vm1250_vm15 = vcmp.eq.s32.totalorder %v2585_v15, %v2574_v11 }
 0x964   :  { %vm1251_vm0 = vcmp.eq.s32.totalorder %v2588_v17, %v2574_v11  ;;  %vm1252_vm1 = vcmp.eq.s32.totalorder %v2591_v34, %v2574_v11  ;;  %vm1253_vm2 = vcmp.eq.s32.totalorder %v2594_v18, %v2574_v11  ;;  %vm1254_vm3 = vcmp.eq.s32.totalorder %v2597_v19, %v2574_v11 }
 0x965   :  { %vm1255_vm4 = vcmp.eq.s32.totalorder %v2600_v20, %v2574_v11 }
 0x966   :  { %v2576_v1 = vpop.permute.xlu1 %1257 }
 0x967   :  { %v2689_v63 = vsel %vm1247_vm12, %v2576_v1, 0.0  ;;  %v2696_v33 = vsel %vm1248_vm13, %v2576_v1, 0.0  ;;  %v2699_v2 = vsel %vm1249_vm14, %v2576_v1, 0.0  ;;  %v2702_v3 = vsel %vm1250_vm15, %v2576_v1, 0.0 }
 0x968   :  { %v2705_v5 = vsel %vm1251_vm0, %v2576_v1, 0.0  ;;  %v2708_v6 = vsel %vm1252_vm1, %v2576_v1, 0.0  ;;  %v2721_v10 = vsel %vm1253_vm2, %v2576_v1, 0.0  ;;  %vm1179_vm12 = vcmp.eq.s32.totalorder %v2361_v8, %v2672_v0 }
 0x969   :  { %v2738_v24 = vsel %vm1254_vm3, %v2576_v1, 0.0  ;;  %v2744_v25 = vsel %vm1255_vm4, %v2576_v1, 0.0  ;;  %vm1213_vm13 = vcmp.eq.s32.totalorder %v2361_v8, %v2572_v46  ;;  %v1192_v35 = vsel %vm1179_vm12, %v2570_v9, 0.0 }
 0x96a   :  { %v2602_v21 = vpop.permute.xlu1 %1291  ;;  %vm1214_vm14 = vcmp.eq.s32.totalorder %v2579_v13, %v2572_v46  ;;  %vm1215_vm15 = vcmp.eq.s32.totalorder %v2582_v14, %v2572_v46  ;;  %vm1216_vm0 = vcmp.eq.s32.totalorder %v2585_v15, %v2572_v46  ;;  %vm1180_vm1 = vcmp.eq.s32.totalorder %v2579_v13, %v2672_v0 }
 0x96b   :  { %vm1181_vm2 = vcmp.eq.s32.totalorder %v2582_v14, %v2672_v0  ;;  %vm1217_vm3 = vcmp.eq.s32.totalorder %v2588_v17, %v2572_v46  ;;  %vm1218_vm4 = vcmp.eq.s32.totalorder %v2591_v34, %v2572_v46  ;;  %v1226_v41 = vsel %vm1213_vm13, %v1224_v47, 0.0 }
 0x96c   :  { %vm1186_vm12 = vcmp.eq.s32.totalorder %v2597_v19, %v2672_v0  ;;  %v1201_v44 = vadd.f32 %v1192_v35, %v1167_v60  ;;  %v1193_v51 = vsel %vm1180_vm1, %v2570_v9, 0.0  ;;  %v1194_v45 = vsel %vm1181_vm2, %v2570_v9, 0.0 }
 0x96d   :  { %vm1220_vm13 = vcmp.eq.s32.totalorder %v2597_v19, %v2572_v46  ;;  %vm1282_vm1 = vcmp.eq.s32.totalorder %v2579_v13, %v2803_v36  ;;  %vm1283_vm2 = vcmp.eq.s32.totalorder %v2582_v14, %v2803_v36 }
 0x96e   :  { %v2629_v27 = vpop.permute.xlu1 %1313  ;;  %v1235_v37 = vadd.f32 %v1226_v41, %v1201_v44  ;;  %v1202_v41 = vadd.f32 %v1193_v51, %v2650_v38  ;;  %v1203_v44 = vadd.f32 %v1194_v45, %v2652_v39 }
 0x970   :  { %v1269_v38 = vadd.f32 %v2689_v63, %v1235_v37  ;;  %v1233_v63 = vsel %vm1220_vm13, %v1224_v47, 0.0  ;;  %vm1319_vm13 = vcmp.eq.s32.totalorder %v2588_v17, %v2629_v27 }
 0x972   :  { %v2662_v54 = vpop.permute.xlu1 %1347 }
 0x973   :  { %vm1349_vm5 = vcmp.eq.s32.totalorder %v2361_v8, %v2662_v54  ;;  %vm1350_vm6 = vcmp.eq.s32.totalorder %v2579_v13, %v2662_v54  ;;  %vm1351_vm7 = vcmp.eq.s32.totalorder %v2582_v14, %v2662_v54  ;;  %vm1352_vm8 = vcmp.eq.s32.totalorder %v2585_v15, %v2662_v54 }
 0x974   :  { %vm1353_vm9 = vcmp.eq.s32.totalorder %v2588_v17, %v2662_v54  ;;  %vm1354_vm10 = vcmp.eq.s32.totalorder %v2591_v34, %v2662_v54  ;;  %vm1355_vm11 = vcmp.eq.s32.totalorder %v2594_v18, %v2662_v54 }
 0x976   :  { %v2710_v7 = vpop.permute.xlu1 %1359 }
 0x977   :  { %v2747_v28 = vsel %vm1349_vm5, %v2710_v7, 0.0  ;;  %v2750_v29 = vsel %vm1350_vm6, %v2710_v7, 0.0  ;;  %v2753_v30 = vsel %vm1351_vm7, %v2710_v7, 0.0  ;;  %v2756_v31 = vsel %vm1352_vm8, %v2710_v7, 0.0 }
 0x978   :  { %3063 = vst [vmem:[#allocation34_spill] sm:$0xff] %v2753_v30  ;;  %3064 = vst [vmem:[#allocation35_spill] sm:$0xff] %v2756_v31  ;;  %v2761_v32 = vsel %vm1353_vm9, %v2710_v7, 0.0  ;;  %v2764_v11 = vsel %vm1354_vm10, %v2710_v7, 0.0  ;;  %v2767_v1 = vsel %vm1355_vm11, %v2710_v7, 0.0  ;;  %vm1182_vm7 = vcmp.eq.s32.totalorder %v2585_v15, %v2672_v0 }
 0x979   :  { %3065 = vst [vmem:[#allocation36_spill] sm:$0xff] %v2761_v32  ;;  %3066 = vst [vmem:[#allocation37_spill] sm:$0xff] %v2764_v11  ;;  %vm1183_vm8 = vcmp.eq.s32.totalorder %v2588_v17, %v2672_v0  ;;  %vm1184_vm10 = vcmp.eq.s32.totalorder %v2591_v34, %v2672_v0  ;;  %vm1185_vm11 = vcmp.eq.s32.totalorder %v2594_v18, %v2672_v0  ;;  %v1195_v48 = vsel %vm1182_vm7, %v2570_v9, 0.0 }
 0x97a   :  { %3067 = vst [vmem:[#allocation38_spill] sm:$0xff] %v2767_v1  ;;  %vm1187_vm6 = vcmp.eq.s32.totalorder %v2600_v20, %v2672_v0  ;;  %v1196_v56 = vsel %vm1183_vm8, %v2570_v9, 0.0  ;;  %vm1221_vm5 = vcmp.eq.s32.totalorder %v2600_v20, %v2572_v46  ;;  %vm1281_vm9 = vcmp.eq.s32.totalorder %v2361_v8, %v2803_v36 }
 0x97b   :  { %v1197_v57 = vsel %vm1184_vm10, %v2570_v9, 0.0  ;;  %v1198_v60 = vsel %vm1185_vm11, %v2570_v9, 0.0  ;;  %v1199_v0 = vsel %vm1186_vm12, %v2570_v9, 0.0  ;;  %v1200_v35 = vsel %vm1187_vm6, %v2570_v9, 0.0 }
 0x97c   :  { %v1227_v1 = vsel %vm1214_vm14, %v1224_v47, 0.0  ;;  %v1204_v11 = vadd.f32 %v1195_v48, %v2658_v50  ;;  %v1205_v32 = vadd.f32 %v1196_v56, %v2660_v53  ;;  %v1228_v31 = vsel %vm1215_vm15, %v1224_v47, 0.0 }
 0x97d   :  { %v1229_v9 = vsel %vm1216_vm0, %v1224_v47, 0.0  ;;  %v1294_v39 = vsel %vm1281_vm9, %v2602_v21, 0.0  ;;  %v1206_v51 = vadd.f32 %v1197_v57, %v2664_v26  ;;  %v1207_v45 = vadd.f32 %v1198_v60, %v2666_v4 }
 0x97e   :  { %v1230_v50 = vsel %vm1217_vm3, %v1224_v47, 0.0  ;;  %v1231_v53 = vsel %vm1218_vm4, %v1224_v47, 0.0  ;;  %vm3068_vm14 = vcmp.eq.s32.totalorder %v2594_v18, %v2572_v46  ;;  %v1236_v56 = vadd.f32 %v1227_v1, %v1202_v41 }
 0x97f   :  { %v1232_v48 = vsel %vm3068_vm14, %v1224_v47, 0.0  ;;  %v1234_v26 = vsel %vm1221_vm5, %v1224_v47, 0.0  ;;  %v1237_v4 = vadd.f32 %v1228_v31, %v1203_v44  ;;  %v1238_v37 = vadd.f32 %v1229_v9, %v1204_v11 }
 0x980   :  { %v1208_v57 = vadd.f32 %v1199_v0, %v2682_v43  ;;  %v1209_v60 = vadd.f32 %v1200_v35, %v2684_v61  ;;  %vm3069_vm15 = vcmp.eq.s32.totalorder %v2597_v19, %v2662_v54  ;;  %vm3070_vm0 = vcmp.eq.s32.totalorder %v2600_v20, %v2662_v54 }
 0x981   :  { %v2865_v30 = vsel %vm3069_vm15, %v2710_v7, 0.0  ;;  %v2871_v1 = vsel %vm3070_vm0, %v2710_v7, 0.0  ;;  %v1303_v46 = vadd.f32 %v1294_v39, %v1269_v38  ;;  %v1239_v47 = vadd.f32 %v1230_v50, %v1205_v32 }
 0x982   :  { %v1240_v31 = vadd.f32 %v1231_v53, %v1206_v51  ;;  %v1241_v11 = vadd.f32 %v1232_v48, %v1207_v45  ;;  %v1242_v41 = vadd.f32 %v1233_v63, %v1208_v57  ;;  %v1243_v43 = vadd.f32 %v1234_v26, %v1209_v60 }
 0x983   :  { %v1270_v61 = vadd.f32 %v2696_v33, %v1236_v56  ;;  %v1271_v0 = vadd.f32 %v2699_v2, %v1237_v4  ;;  %v1272_v35 = vadd.f32 %v2702_v3, %v1238_v37  ;;  %vm1284_vm3 = vcmp.eq.s32.totalorder %v2585_v15, %v2803_v36 }
 0x984   :  { %vm1285_vm4 = vcmp.eq.s32.totalorder %v2588_v17, %v2803_v36  ;;  %vm1286_vm5 = vcmp.eq.s32.totalorder %v2591_v34, %v2803_v36  ;;  %vm1287_vm6 = vcmp.eq.s32.totalorder %v2594_v18, %v2803_v36  ;;  %v1273_v33 = vadd.f32 %v2705_v5, %v1239_v47 }
 0x985   :  { %vm1288_vm7 = vcmp.eq.s32.totalorder %v2597_v19, %v2803_v36  ;;  %vm1289_vm8 = vcmp.eq.s32.totalorder %v2600_v20, %v2803_v36  ;;  %v2059_v2 = vmov 1983009808   ;;  %v1274_v7 = vadd.f32 %v2708_v6, %v1240_v31 }
 0x986   :  { %v1420_v3 = vunpack.c.l.s4 %v2059_v2  ;;  %v1295_v32 = vsel %vm1282_vm1, %v2602_v21, 0.0  ;;  %v1296_v44 = vsel %vm1283_vm2, %v2602_v21, 0.0  ;;  %v1297_v9 = vsel %vm1284_vm3, %v2602_v21, 0.0 }
 0x987   :  { %v1298_v38 = vsel %vm1285_vm4, %v2602_v21, 0.0  ;;  %v1299_v5 = vsel %vm1286_vm5, %v2602_v21, 0.0  ;;  %v1300_v39 = vsel %vm1287_vm6, %v2602_v21, 0.0  ;;  %v1275_v51 = vadd.f32 %v2721_v10, %v1241_v11 }
 0x988   :  { %v1276_v36 = vadd.f32 %v2738_v24, %v1242_v41  ;;  %v1301_v45 = vsel %vm1288_vm7, %v2602_v21, 0.0  ;;  %v1302_v6 = vsel %vm1289_vm8, %v2602_v21, 0.0  ;;  %v1277_v50 = vadd.f32 %v2744_v25, %v1243_v43 }
 0x989   :  { %v1304_v53 = vadd.f32 %v1295_v32, %v1270_v61  ;;  %v1305_v48 = vadd.f32 %v1296_v44, %v1271_v0  ;;  %v1421_v56 = vunpack.c.0.s8 %v1420_v3  ;;  %v1306_v63 = vadd.f32 %v1297_v9, %v1272_v35 }
 0x98a   :  { %v1307_v26 = vadd.f32 %v1298_v38, %v1273_v33  ;;  %v1308_v4 = vadd.f32 %v1299_v5, %v1274_v7  ;;  %v1309_v37 = vadd.f32 %v1300_v39, %v1275_v51  ;;  %vm1315_vm9 = vcmp.eq.s32.totalorder %v2361_v8, %v2629_v27 }
 0x98b   :  { %v1310_v57 = vadd.f32 %v1301_v45, %v1276_v36  ;;  %v1311_v10 = vadd.f32 %v1302_v6, %v1277_v50  ;;  %vm1316_vm10 = vcmp.eq.s32.totalorder %v2579_v13, %v2629_v27  ;;  %vm1317_vm11 = vcmp.eq.s32.totalorder %v2582_v14, %v2629_v27 }
 0x98c   :  { %vm1318_vm12 = vcmp.eq.s32.totalorder %v2585_v15, %v2629_v27  ;;  %vm1320_vm14 = vcmp.eq.s32.totalorder %v2591_v34, %v2629_v27  ;;  %vm1321_vm15 = vcmp.eq.s32.totalorder %v2594_v18, %v2629_v27  ;;  %vm1322_vm0 = vcmp.eq.s32.totalorder %v2597_v19, %v2629_v27 }
 0x98d   :  { %vm1323_vm1 = vcmp.eq.s32.totalorder %v2600_v20, %v2629_v27  ;;  %v2924_v8 = vsub.s32 %v1421_v56, %v2332_v23 }
 0x9bd   :  { %v1026_v54 = vpop.xlane.xlu0 %1025 }
 0x9be   :  { %1715 = vrcp.f32 %v1026_v54 }
 0x9c5   :  { %v1326_v21 = vpop.permute.xlu0 %1325 }
 0x9c6   :  { %v1328_v13 = vsel %vm1315_vm9, %v1326_v21, 0.0  ;;  %v1329_v14 = vsel %vm1316_vm10, %v1326_v21, 0.0  ;;  %v1330_v15 = vsel %vm1317_vm11, %v1326_v21, 0.0  ;;  %v1331_v17 = vsel %vm1318_vm12, %v1326_v21, 0.0 }
 0x9c7   :  { %v1337_v34 = vadd.f32 %v1328_v13, %v1303_v46  ;;  %v1332_v24 = vsel %vm1319_vm13, %v1326_v21, 0.0  ;;  %v1333_v25 = vsel %vm1320_vm14, %v1326_v21, 0.0  ;;  %v1334_v60 = vsel %vm1321_vm15, %v1326_v21, 0.0 }
 0x9c8   :  { %v1716_v18 = vpop.eup %1715  ;;  %v1335_v47 = vsel %vm1322_vm0, %v1326_v21, 0.0  ;;  %v1336_v23 = vsel %vm1323_vm1, %v1326_v21, 0.0  ;;  %v1338_v31 = vadd.f32 %v1329_v14, %v1304_v53  ;;  %v1339_v11 = vadd.f32 %v1330_v15, %v1305_v48 }
 0x9c9   :  { %v1028_v41 = vmul.f32 %v1716_v18, %v2520_v40  ;;  %v1371_v46 = vadd.f32 %v2747_v28, %v1337_v34  ;;  %v1029_v43 = vmul.f32 %v1716_v18, %v2522_v42  ;;  %v1030_v61 = vmul.f32 %v1716_v18, %v2526_v49 }
 0x9ca   :  { %v1031_v0 = vmul.f32 %v1716_v18, %v2530_v52  ;;  %v1032_v19 = vmul.f32 %v1716_v18, %v2534_v55  ;;  %v1033_v35 = vmul.f32 %v1716_v18, %v2538_v58  ;;  %v1034_v20 = vmul.f32 %v1716_v18, %v2542_v59 }
 0x9cb   :  { %1037 = vst [vmem:[#allocation20] sm:$0x3] %v1028_v41  ;;  %v1380_v40 = vmul.f32 %v2491_v12, %v1028_v41  ;;  %v1390_v27 = vmul.f32 %v2732_v22, %v1371_v46  ;;  %v1035_v28 = vmul.f32 %v1716_v18, %v2546_v62  ;;  %v1036_v42 = vmul.f32 %v1716_v18, %v2550_v16 }
 0x9cc   :  { %1958 = shalt.err (!%p1955_p3)
}
 0x9cd   :  { %s1959_s1 = scalar_lea.hbm %s3035_s20, 32 }
 0x9ce   :  { %p1960_p4 = scmp.ne.s32.totalorder %s3035_s20, %s1959_s1  ;;  %p1963_p5 = scmp.lt.u32.totalorder %s1959_s1, %s3035_s20 }
 0x9d0   :  { %p1965_p6 = pnand %p1963_p5, %p1960_p4 }
 0x9d2   :  { %1968 = shalt.err (!%p1965_p6)
}
 0x9d3   :  { %1483 = dma.vmem_to_hbm [thread:$0]  %s1481_s3, 32, %s3035_s20, [#allocation21]   ;;  %v1340_v49 = vadd.f32 %v1331_v17, %v1306_v63  ;;  %v1341_v52 = vadd.f32 %v1332_v24, %v1307_v26  ;;  %v1342_v55 = vadd.f32 %v1333_v25, %v1308_v4  ;;  %v1343_v58 = vadd.f32 %v1334_v60, %v1309_v37 }
 0x9d4   :  { %v1399_v59 = vadd.f32 %v1390_v27, %v1380_v40  ;;  %v1344_v62 = vadd.f32 %v1335_v47, %v1310_v57  ;;  %v1345_v16 = vadd.f32 %v1336_v23, %v1311_v10  ;;  %v1372_v54 = vadd.f32 %v2750_v29, %v1338_v31  ;;  %s1969_s15 = scalar_lea.vmem %s2940_s25, 32  ;;  %p1974_p8 = scmp.lt.s32.totalorder %s2940_s25, %s2940_s25 }
 0x9d5   :  { %p1970_p7 = scmp.ne.s32.totalorder %s2940_s25, %s1969_s15  ;;  %p1975_p9 = scmp.lt.s32.totalorder %s1969_s15, %s1969_s15 }
 0x9d7   :  { %p1976_p10 = por %p1975_p9, %p1974_p8 }
 0x9d9   :  { %p1977_p11 = pnand %p1976_p10, %p1970_p7 }
 0x9db   :  { %1980 = shalt.err (!%p1977_p11)
}
 0x9dc   :  { %s1981_s20 = scalar_lea.hbm %s3036_s21, 32 }
 0x9dd   :  { %p1982_p12 = scmp.ne.s32.totalorder %s3036_s21, %s1981_s20  ;;  %p1985_p13 = scmp.lt.u32.totalorder %s1981_s20, %s3036_s21 }
 0x9df   :  { %p1987_p0 = pnand %p1985_p13, %p1982_p12 }
 0x9e1   :  { %1990 = shalt.err (!%p1987_p0)
}
 0x9e2   :  { %1493 = dma.vmem_to_hbm [thread:$0]  %s2940_s25, 32, %s3036_s21, [#allocation21]   ;;  %v3071_v29 = vld [vmem:[#allocation34_spill] sm:$0xff]  ;;  %v3072_v2 = vld [vmem:[#allocation35_spill] sm:$0xff]  ;;  %v3073_v7 = vld [vmem:[#allocation36_spill] sm:$0xff]  ;;  %v1378_v39 = vadd.f32 %v2865_v30, %v1344_v62  ;;  %v1379_v51 = vadd.f32 %v2871_v1, %v1345_v16  ;;  %v1381_v36 = vmul.f32 %v2491_v12, %v1029_v43  ;;  %v1382_v45 = vmul.f32 %v2491_v12, %v1030_v61 }
 0x9e3   :  { %v1373_v33 = vadd.f32 %v3071_v29, %v1339_v11  ;;  %v1374_v3 = vadd.f32 %v3072_v2, %v1340_v49  ;;  %v1375_v32 = vadd.f32 %v3073_v7, %v1341_v52  ;;  %v3074_v44 = vld [vmem:[#allocation37_spill] sm:$0xff]  ;;  %v3075_v38 = vld [vmem:[#allocation38_spill] sm:$0xff]  ;;  %v1383_v6 = vmul.f32 %v2491_v12, %v1031_v0  ;;  %s2062_s21 = smov [#allocation19]  }
 0x9e4   :  { %v1376_v9 = vadd.f32 %v3074_v44, %v1342_v55  ;;  %v1377_v5 = vadd.f32 %v3075_v38, %v1343_v58  ;;  %v1384_v50 = vmul.f32 %v2491_v12, %v1032_v19  ;;  %v1385_v53 = vmul.f32 %v2491_v12, %v1033_v35  ;;  %s1470_s28 = sshll.u32 %s2062_s21, 4  ;;  %s1471_s28 = int_to_ptr.vmem [resolvable:$true] %s1470_s28 }
 0x9e5   :  { %v1386_v48 = vmul.f32 %v2491_v12, %v1034_v20  ;;  %v1387_v56 = vmul.f32 %v2491_v12, %v1035_v28  ;;  %v1388_v63 = vmul.f32 %v2491_v12, %v1036_v42  ;;  %v1391_v30 = vmul.f32 %v2732_v22, %v1372_v54  ;;  %s1991_s11 = scalar_lea.vmem %s1471_s28, 288  ;;  %p1996_p2 = scmp.lt.s32.totalorder %s1471_s28, %s1471_s28 }
 0x9e6   :  { %v1392_v1 = vmul.f32 %v2732_v22, %v1373_v33  ;;  %v1393_v26 = vmul.f32 %v2732_v22, %v1374_v3  ;;  %v1394_v4 = vmul.f32 %v2732_v22, %v1375_v32  ;;  %v1395_v37 = vmul.f32 %v2732_v22, %v1376_v9  ;;  %p1992_p1 = scmp.ne.s32.totalorder %s1471_s28, %s1991_s11  ;;  %p1997_p3 = scmp.lt.s32.totalorder %s1991_s11, %s1991_s11 }
 0x9e7   :  { %v1396_v57 = vmul.f32 %v2732_v22, %v1377_v5  ;;  %v1397_v10 = vmul.f32 %v2732_v22, %v1378_v39  ;;  %v1398_v21 = vmul.f32 %v2732_v22, %v1379_v51  ;;  %v1400_v13 = vadd.f32 %v1391_v30, %v1381_v36 }
 0x9e8   :  { %v1401_v14 = vadd.f32 %v1392_v1, %v1382_v45  ;;  %v1402_v15 = vadd.f32 %v1393_v26, %v1383_v6  ;;  %v1403_v12 = vadd.f32 %v1394_v4, %v1384_v50  ;;  %v1404_v17 = vadd.f32 %v1395_v37, %v1385_v53  ;;  %p1998_p4 = por %p1997_p3, %p1996_p2 }
 0x9e9   :  { %v1405_v34 = vadd.f32 %v1396_v57, %v1386_v48  ;;  %v1406_v24 = vadd.f32 %v1397_v10, %v1387_v56  ;;  %v1407_v25 = vadd.f32 %v1398_v21, %v1388_v63  ;;  %v1417_v60 = vcombine.low %v1399_v59, %v1400_v13 }
 0x9ea   :  { %v1418_v18 = vcombine.low %v1401_v14, %v1402_v15  ;;  %v1434_v47 = vcombine.low %v1403_v12, %v1404_v17  ;;  %p1999_p5 = pnand %p1998_p4, %p1992_p1 }
 0x9eb   :  { %v1425_v23 = vrot.slane %v1417_v60, %v2924_v8  ;;  %v1435_v31 = vcombine.low %v1405_v34, %v1406_v24  ;;  %1566 = vst.sshfl [vmem:[#allocation19 + $0x10] sm:$0x3 pattern:$0x76325410] %v1407_v25 }
 0x9ec   :  { %v1432_v11 = vrot.slane %v1418_v18, %v2924_v8  ;;  %v1442_v41 = vrot.slane %v1434_v47, %v2924_v8 }
 0x9ed   :  { %v1449_v22 = vrot.slane %v1435_v31, %v2924_v8 }
 0x9ee   :  { %v1433_v46 = vcombine.low %v1425_v23, %v1432_v11 }
 0x9ef   :  { %v1450_v43 = vcombine.low %v1442_v41, %v1449_v22 }
 0x9f0   :  { %1461 = vst [vmem:[#allocation19] sm:$0xff] %v1433_v46 }
 0x9f1   :  { %1462 = vst [vmem:[#allocation19 + $0x8] sm:$0xff] %v1450_v43 }
 0x9f2   :  { %2002 = shalt.err (!%p1999_p5)
}
 0x9f3   :  { %s3076_s5 = sld [smem:[#allocation47_spill]] }
 0x9f9   :  { %s2003_s17 = scalar_lea.hbm %s3076_s5, 288 }
 0x9fa   :  { %p2004_p6 = scmp.ne.s32.totalorder %s3076_s5, %s2003_s17  ;;  %p2007_p7 = scmp.lt.u32.totalorder %s2003_s17, %s3076_s5 }
 0x9fc   :  { %p2009_p8 = pnand %p2007_p7, %p2004_p6 }
 0x9fe   :  { %2012 = shalt.err (!%p2009_p8)
}
 0x9ff   :  { %1473 = dma.vmem_to_hbm [thread:$0]  %s1471_s28, 288, %s3076_s5, [#allocation4]  }
 0xa00   :  { %2025 = dma.done.wait [#allocation4], 288  }
 0xa01   :  { %2026 = vsyncadd [#allocation4], 4294967008 }
 0xa02   :  { %2027 = dma.done.wait [#allocation21], 64  }
 0xa03   :  { %2028 = vsyncadd [#allocation21], 4294967232 }
 0xa04   :  { %2029 = dma.done.wait [#allocation24], 32  }
 0xa05   :  { %2030 = vsyncadd [#allocation24], 4294967264 }
 0xa06   :  { %1520 = vsyncpa [#allocation3], 1 }
 0xa07   :  { %1521 = vsyncpa [#allocation8], 1 }
 0xa08   :  { %1522 = vsyncpa [#allocation11], 1 }
 0xa09   :  { %1523 = vsyncpa [#allocation14], 1 }
 0xa0a   :  { %1524 = vsyncpa [#allocation17], 1 }
 0xa0b   :  { %1525 = vsyncpa [#allocation4], 1 }
 0xa0c   :  { %1526 = vsyncpa [#allocation21], 1 }
 0xa0d   :  { %1527 = vsyncpa [#allocation24], 1 }
 0xa0e   :  { %1528 = vsyncpa [#allocation5], 1 }

</bundles_post_ra>
